<compile_context>
chip_gen: v7x
topology: tpu7x:2x2x1
jax: 0.10.0
libtpu: 0.0.40
codegen_flags: <defaults>
</compile_context>

<pallas_src>
import functools

import jax
import jax.numpy as jnp
from jax.experimental import pallas as pl
from jax.experimental.pallas import tpu as pltpu


def _round_up(x, m):
    return (x + m - 1) // m * m


# ---------------------------------------------------------------------------
# In-kernel math helpers
# ---------------------------------------------------------------------------
def _sigmoid_approx(x):
    # exp -> EUP slot, approx reciprocal -> EUP slot (keeps the 4 VALU slots
    # free for the mul/add work of the surrounding layer).
    return pl.reciprocal(1.0 + jnp.exp(-x), approx=True)


def _silu(x):
    # SiLU(x) = x * sigmoid(x)
    return x * _sigmoid_approx(x)


def _apply_out_activation(y, out_activation):
    # Output activation uses *exact* math (no approx reciprocal) so the final
    # result does not carry the compounded approximation error of the hidden
    # layers (review correctness note).
    if out_activation == "tanh":
        return jnp.tanh(y)
    elif out_activation == "sigmoid":
        return 1.0 / (1.0 + jnp.exp(-y))
    elif out_activation == "relu":
        return jnp.maximum(y, 0.0)
    elif out_activation == "leaky_relu":
        return jnp.where(y >= 0.0, y, 0.01 * y)
    elif out_activation is None:
        return y
    else:
        raise ValueError(f"Unknown output activation: {out_activation}")


# ---------------------------------------------------------------------------
# Kernel
# ---------------------------------------------------------------------------
def _mlp_kernel(*refs, n_hidden_layers, activation, out_activation,
                mxu_dtype, compute_dtype):
    # refs = (x_ref, W1, b1, ..., Wk, bk, Wout, bout, y_ref)
    x_ref = refs[0]
    y_ref = refs[-1]
    param_refs = refs[1:-1]

    # Like the PyTorch module (`activation_map.get(activation, nn.SiLU())`),
    # unknown hidden-activation names silently fall back to SiLU.
    act = {"silu": _silu,
           "relu": lambda v: jnp.maximum(v, 0),
           "sigmoid": _sigmoid_approx}.get(activation, _silu)

    h = x_ref[...]
    for layer in range(n_hidden_layers):
        w_ref = param_refs[2 * layer]
        b_ref = param_refs[2 * layer + 1]
        # Weights arrive pre-cast to mxu_dtype (no per-step cast of resident
        # weights); accumulate in f32 on the MXU; bias add in f32; activation
        # math in compute_dtype (f32 everywhere, bf16 optionally on v6e/v7x).
        acc = jnp.dot(h.astype(mxu_dtype), w_ref[...],
                      preferred_element_type=jnp.float32)
        h = act((acc + b_ref[...]).astype(compute_dtype))

    wo_ref = param_refs[-2]
    bo_ref = param_refs[-1]
    y = jnp.dot(h.astype(mxu_dtype), wo_ref[...],
                preferred_element_type=jnp.float32)
    y = _apply_out_activation(y + bo_ref[...], out_activation)
    # Lane-dense (multiple-of-128) store: unmasked full-width vst.
    y_ref[...] = y.astype(y_ref.dtype)


# ---------------------------------------------------------------------------
# Parameter init (mirrors nn.Linear's U(-1/sqrt(fan_in), 1/sqrt(fan_in)))
# ---------------------------------------------------------------------------
def make_nn_params(key, n_in, n_out, nNodes, nLayers, dtype=jnp.float32):
    """Weights stored [fan_in, fan_out] (transposed vs PyTorch), biases [1, fan_out]."""
    params = []
    dims = [n_in] + [nNodes] * nLayers + [n_out]
    for i in range(len(dims) - 1):
        fan_in, fan_out = dims[i], dims[i + 1]
        key, kw, kb = jax.random.split(key, 3)
        bound = 1.0 / float(fan_in) ** 0.5
        w = jax.random.uniform(kw, (fan_in, fan_out), dtype, -bound, bound)
        b = jax.random.uniform(kb, (1, fan_out), dtype, -bound, bound)
        params.append((w, b))
    return params


# ---------------------------------------------------------------------------
# Wrapper
# ---------------------------------------------------------------------------
def _vmem_budget_bytes():
    # v5e/v6e have 128 MiB VMEM per core; v7x only 64 MiB. Stay conservative
    # for anything we cannot positively identify.
    try:
        kind = jax.devices()[0].device_kind.lower()
    except Exception:
        kind = ""
    if "v5" in kind or "v6" in kind:
        return 96 * 1024 * 1024
    return 48 * 1024 * 1024


def _vmem_estimate_bytes(tile, n_in, n_out_p, eff_params, out_itemsize,
                         weight_buffers):
    p_bytes = sum(w.size * w.dtype.itemsize + b.size * b.dtype.itemsize
                  for (w, b) in eff_params)
    x_bytes = 2 * tile * n_in * 4                  # double-buffered input tile
    y_bytes = 2 * tile * n_out_p * out_itemsize    # double-buffered output tile
    widest = max([n_in] + [w.shape[1] for (w, _) in eff_params])
    act_bytes = 3 * tile * widest * 4              # live activations / temporaries
    return weight_buffers * p_bytes + x_bytes + y_bytes + act_bytes


def nn_forward(x, params, *, activation="silu", out_activation=None,
               batch_tile=1024, mxu_dtype=jnp.bfloat16,
               compute_dtype=jnp.float32, out_dtype=None,
               single_buffer_weights=None):
    """Fused-MLP Pallas kernel. x: [B, n_in] (any B; zero-padded internally).

    mxu_dtype:     matmul operand dtype (bf16 = native MXU path, f32 accumulate;
                   pass jnp.float32 for full-precision accuracy-sensitive runs).
    compute_dtype: bias-add / hidden-activation dtype. f32 is safe everywhere;
                   jnp.bfloat16 roughly doubles epilogue throughput on v6e/v7x
                   (bf16 VPU/EUP) but must NOT be used on v5e.
    out_dtype:     dtype of the stored (lane-padded) output. jnp.bfloat16 halves
                   the padded-output writeback bytes (useful on v5e/v6e).
    single_buffer_weights: single-buffer the constant (resident) weight blocks.
                   None = auto-detect; falls back to default double-buffering
                   if the installed JAX rejects pl.Buffered(1).
    """
    B, n_in = x.shape
    n_hidden_layers = len(params) - 1
    n_out = params[-1][0].shape[1]
    out_dtype = x.dtype if out_dtype is None else out_dtype
    out_itemsize = jnp.dtype(out_dtype).itemsize

    # -- Lane-dense feature dims: zero-pad hidden width and n_out to multiples
    #    of 128 (identical math — padded weight rows/cols are zero); n_in stays
    #    unpadded to avoid amplifying input HBM traffic.
    width_p = _round_up(params[0][0].shape[1], 128)
    n_out_p = _round_up(n_out, 128)
    dims_p = [n_in] + [width_p] * n_hidden_layers + [n_out_p]

    eff_params = []
    for i, (w, b) in enumerate(params):
        ri, ro = dims_p[i], dims_p[i + 1]
        w = jnp.pad(w, ((0, ri - w.shape[0]), (0, ro - w.shape[1])))
        b = jnp.pad(b, ((0, 0), (0, ro - b.shape[1])))
        # Pre-cast weights to the MXU dtype ONCE here (halves their DMA bytes
        # and VMEM residency, removes the per-step cast from the kernel body).
        eff_params.append((w.astype(mxu_dtype), b.astype(jnp.float32)))
    flat_params = [a for wb in eff_params for a in wb]

    # -- Batch tiling: large tile amortizes grid-step overhead; cap at half the
    #    padded batch so there are >=2 "parallel" steps for v7x's two cores.
    min_tile = 8
    b8 = _round_up(max(B, 1), min_tile)
    tile = max(min_tile, (min(batch_tile, b8) // min_tile) * min_tile)
    if b8 >= 2 * min_tile:
        tile = min(tile, _round_up(b8 // 2, min_tile))

    # -- Shrink the tile if the VMEM estimate (conservatively assuming
    #    double-buffered weights) exceeds the per-generation budget.
    budget = _vmem_budget_bytes()
    while tile > min_tile and _vmem_estimate_bytes(
            tile, n_in, n_out_p, eff_params, out_itemsize, 2) > budget:
        tile = max(min_tile, (tile // 2 // min_tile) * min_tile)

    padded_B = _round_up(B, tile)
    if padded_B != B:
        x = jnp.pad(x, ((0, padded_B - B), (0, 0)))
    grid = (padded_B // tile,)

    # -- Advisory cost estimate for XLA's scheduler around the custom call.
    flops = 2 * padded_B * sum(w.shape[0] * w.shape[1] for (w, _) in eff_params)
    transcendentals = padded_B * width_p * n_hidden_layers
    if out_activation in ("tanh", "sigmoid"):
        transcendentals += padded_B * n_out_p
    bytes_accessed = (padded_B * n_in * jnp.dtype(x.dtype).itemsize
                      + sum(w.size * w.dtype.itemsize + b.size * b.dtype.itemsize
                            for (w, b) in eff_params)
                      + padded_B * n_out_p * out_itemsize)
    cost = pl.CostEstimate(flops=int(flops),
                           transcendentals=int(transcendentals),
                           bytes_accessed=int(bytes_accessed))

    kernel = functools.partial(
        _mlp_kernel,
        n_hidden_layers=n_hidden_layers,
        activation=activation,
        out_activation=out_activation,
        mxu_dtype=mxu_dtype,
        compute_dtype=compute_dtype,
    )

    def _run(single_buffer):
        def _const_spec(shape):
            # Whole-array block, constant index_map -> fetched once. Single
            # buffering halves its resident VMEM footprint.
            if single_buffer:
                return pl.BlockSpec(shape, lambda i: (0, 0),
                                    pipeline_mode=pl.Buffered(1))
            return pl.BlockSpec(shape, lambda i: (0, 0))

        in_specs = [pl.BlockSpec((tile, n_in), lambda i: (i, 0))]
        for (w, b) in eff_params:
            in_specs.append(_const_spec(w.shape))
            in_specs.append(_const_spec(b.shape))
        out_specs = pl.BlockSpec((tile, n_out_p), lambda i: (i, 0))

        return pl.pallas_call(
            kernel,
            out_shape=jax.ShapeDtypeStruct((padded_B, n_out_p), out_dtype),
            grid_spec=pltpu.PrefetchScalarGridSpec(
                num_scalar_prefetch=0,
                grid=grid,
                in_specs=in_specs,
                out_specs=out_specs),
            compiler_params=pltpu.CompilerParams(
                dimension_semantics=("parallel",),   # shards over v7x's 2 TCs
                vmem_limit_bytes=int(budget)),
            cost_estimate=cost,
        )(x, *flat_params)

    want_single = (hasattr(pl, "Buffered") if single_buffer_weights is None
                   else bool(single_buffer_weights))
    if want_single:
        try:
            y_padded = _run(True)
        except Exception:
            # Old JAX / unsupported Buffered(1): fall back to default buffering.
            # (Note: when nn_forward is traced under jit this fallback cannot
            # catch compile errors — pass single_buffer_weights=False there.)
            y_padded = _run(False)
    else:
        y_padded = _run(False)

    # Padded rows / lane-padded columns are sliced off here; the padded columns
    # did pass through out_activation inside the kernel (harmless, discarded).
    return y_padded[:B, :n_out]


# ---------------------------------------------------------------------------
# Pure-JAX reference (same bf16-operand matmuls, exact activations)
# ---------------------------------------------------------------------------
def nn_forward_ref(x, params, *, activation="silu", out_activation=None,
                   mxu_dtype=jnp.bfloat16):
    act = {"silu": jax.nn.silu, "relu": jax.nn.relu,
           "sigmoid": jax.nn.sigmoid}.get(activation, jax.nn.silu)

    def dot(a, w):
        return jnp.dot(a.astype(mxu_dtype), w.astype(mxu_dtype),
                       preferred_element_type=jnp.float32)

    h = x.astype(jnp.float32)
    for (w, b) in params[:-1]:
        h = act(dot(h, w) + b)
    y = dot(h, params[-1][0]) + params[-1][1]
    if out_activation == "tanh":
        y = jnp.tanh(y)
    elif out_activation == "sigmoid":
        y = jax.nn.sigmoid(y)
    elif out_activation == "relu":
        y = jnp.maximum(y, 0.0)
    elif out_activation == "leaky_relu":
        y = jnp.where(y >= 0.0, y, 0.01 * y)
    elif out_activation is None:
        pass
    else:
        raise ValueError(f"Unknown output activation: {out_activation}")
    return y


if __name__ == "__main__":
    # Shapes consistent with NN(n_in=32, n_out=16, nNodes=64, nLayers=2,
    # activation='silu', out_activation='tanh'); batch chosen to exercise the
    # batch-padding path and the >=2-grid-step (two-TensorCore) split.
    n_in, n_out, nNodes, nLayers = 32, 16, 64, 2
    batch = 200

    key = jax.random.PRNGKey(0)
    key_x, key_p = jax.random.split(key)
    x = jax.random.normal(key_x, (batch, n_in), jnp.float32)
    params = make_nn_params(key_p, n_in, n_out, nNodes, nLayers)

    y = nn_forward(x, params, activation="silu", out_activation="tanh")
    y = jax.block_until_ready(y)

    y_ref = nn_forward_ref(x, params, activation="silu", out_activation="tanh")
    assert y.shape == (batch, n_out)
    # bf16 MXU operands + EUP approx-reciprocal hidden SiLU vs. exact reference.
    assert jnp.allclose(y, y_ref, atol=2e-2, rtol=2e-2), "mismatch vs reference"

    print("KERNEL_OK")
</pallas_src>

<mosaic_0001>
module attributes {stable_mosaic.version = 11 : i64} {
  func.func @_mlp_kernel(%arg0: i32, %arg1: memref<104x32xf32, #tpu.memory_space<vmem>>, %arg2: memref<32x128xbf16, #tpu.memory_space<vmem>>, %arg3: memref<1x128xf32, #tpu.memory_space<vmem>>, %arg4: memref<128x128xbf16, #tpu.memory_space<vmem>>, %arg5: memref<1x128xf32, #tpu.memory_space<vmem>>, %arg6: memref<128x128xbf16, #tpu.memory_space<vmem>>, %arg7: memref<1x128xf32, #tpu.memory_space<vmem>>, %arg8: memref<104x128xf32, #tpu.memory_space<vmem>>) attributes {dimension_semantics = [#tpu.dimension_semantics<parallel>], iteration_bounds = array<i64: 2>, scalar_prefetch = 0 : i64, scratch_operands = 0 : i64, tpu.core_type = #tpu.core_type<tc>, window_params = [{transform_indices = @transform_0, window_bounds = array<i64: 104, 32>}, {pipeline_mode = #tpu.pipeline_mode<synchronous>, transform_indices = @transform_1, window_bounds = array<i64: 32, 128>}, {pipeline_mode = #tpu.pipeline_mode<synchronous>, transform_indices = @transform_2, window_bounds = array<i64: 1, 128>}, {pipeline_mode = #tpu.pipeline_mode<synchronous>, transform_indices = @transform_3, window_bounds = array<i64: 128, 128>}, {pipeline_mode = #tpu.pipeline_mode<synchronous>, transform_indices = @transform_4, window_bounds = array<i64: 1, 128>}, {pipeline_mode = #tpu.pipeline_mode<synchronous>, transform_indices = @transform_5, window_bounds = array<i64: 128, 128>}, {pipeline_mode = #tpu.pipeline_mode<synchronous>, transform_indices = @transform_6, window_bounds = array<i64: 1, 128>}, {transform_indices = @transform_7, window_bounds = array<i64: 104, 128>}]} {
    %c0 = arith.constant 0 : index
    %c0_0 = arith.constant 0 : index
    %0 = vector.load %arg1[%c0, %c0_0] : memref<104x32xf32, #tpu.memory_space<vmem>>, vector<104x32xf32>
    %1 = arith.truncf %0 : vector<104x32xf32> to vector<104x32xbf16>
    %c0_1 = arith.constant 0 : index
    %c0_2 = arith.constant 0 : index
    %2 = vector.load %arg2[%c0_1, %c0_2] : memref<32x128xbf16, #tpu.memory_space<vmem>>, vector<32x128xbf16>
    %cst = arith.constant dense<0.000000e+00> : vector<104x128xf32>
    %3 = tpu.matmul %1, %2, %cst {dimension_numbers = #tpu.dot_dimension_numbers<[1], [0], [0], [1], [0, 0, 1, 1], [], []>} : vector<104x32xbf16>, vector<32x128xbf16>, vector<104x128xf32> -> vector<104x128xf32>
    %c0_3 = arith.constant 0 : index
    %c0_4 = arith.constant 0 : index
    %4 = vector.load %arg3[%c0_3, %c0_4] : memref<1x128xf32, #tpu.memory_space<vmem>>, vector<1x128xf32>
    %5 = vector.broadcast %4 : vector<1x128xf32> to vector<104x128xf32>
    %6 = arith.addf %3, %5 : vector<104x128xf32>
    %cst_5 = arith.constant 0.000000e+00 : f32
    %7 = vector.broadcast %cst_5 : f32 to vector<104x128xf32>
    %8 = arith.subf %7, %6 : vector<104x128xf32>
    %9 = math.exp %8 : vector<104x128xf32>
    %cst_6 = arith.constant 1.000000e+00 : f32
    %10 = vector.broadcast %cst_6 : f32 to vector<104x128xf32>
    %11 = arith.addf %10, %9 : vector<104x128xf32>
    %12 = tpu.reciprocal %11 {approx = true} : vector<104x128xf32> -> vector<104x128xf32>
    %13 = arith.mulf %6, %12 : vector<104x128xf32>
    %14 = arith.truncf %13 : vector<104x128xf32> to vector<104x128xbf16>
    %c0_7 = arith.constant 0 : index
    %c0_8 = arith.constant 0 : index
    %15 = vector.load %arg4[%c0_7, %c0_8] : memref<128x128xbf16, #tpu.memory_space<vmem>>, vector<128x128xbf16>
    %cst_9 = arith.constant dense<0.000000e+00> : vector<104x128xf32>
    %16 = tpu.matmul %14, %15, %cst_9 {dimension_numbers = #tpu.dot_dimension_numbers<[1], [0], [0], [1], [0, 0, 1, 1], [], []>} : vector<104x128xbf16>, vector<128x128xbf16>, vector<104x128xf32> -> vector<104x128xf32>
    %c0_10 = arith.constant 0 : index
    %c0_11 = arith.constant 0 : index
    %17 = vector.load %arg5[%c0_10, %c0_11] : memref<1x128xf32, #tpu.memory_space<vmem>>, vector<1x128xf32>
    %18 = vector.broadcast %17 : vector<1x128xf32> to vector<104x128xf32>
    %19 = arith.addf %16, %18 : vector<104x128xf32>
    %cst_12 = arith.constant 0.000000e+00 : f32
    %20 = vector.broadcast %cst_12 : f32 to vector<104x128xf32>
    %21 = arith.subf %20, %19 : vector<104x128xf32>
    %22 = math.exp %21 : vector<104x128xf32>
    %cst_13 = arith.constant 1.000000e+00 : f32
    %23 = vector.broadcast %cst_13 : f32 to vector<104x128xf32>
    %24 = arith.addf %23, %22 : vector<104x128xf32>
    %25 = tpu.reciprocal %24 {approx = true} : vector<104x128xf32> -> vector<104x128xf32>
    %26 = arith.mulf %19, %25 : vector<104x128xf32>
    %27 = arith.truncf %26 : vector<104x128xf32> to vector<104x128xbf16>
    %c0_14 = arith.constant 0 : index
    %c0_15 = arith.constant 0 : index
    %28 = vector.load %arg6[%c0_14, %c0_15] : memref<128x128xbf16, #tpu.memory_space<vmem>>, vector<128x128xbf16>
    %cst_16 = arith.constant dense<0.000000e+00> : vector<104x128xf32>
    %29 = tpu.matmul %27, %28, %cst_16 {dimension_numbers = #tpu.dot_dimension_numbers<[1], [0], [0], [1], [0, 0, 1, 1], [], []>} : vector<104x128xbf16>, vector<128x128xbf16>, vector<104x128xf32> -> vector<104x128xf32>
    %c0_17 = arith.constant 0 : index
    %c0_18 = arith.constant 0 : index
    %30 = vector.load %arg7[%c0_17, %c0_18] : memref<1x128xf32, #tpu.memory_space<vmem>>, vector<1x128xf32>
    %31 = vector.broadcast %30 : vector<1x128xf32> to vector<104x128xf32>
    %32 = arith.addf %29, %31 : vector<104x128xf32>
    %33 = math.tanh %32 : vector<104x128xf32>
    %c0_19 = arith.constant 0 : index
    %c0_20 = arith.constant 0 : index
    %34 = vector.load %arg8[%c0_19, %c0_20] : memref<104x128xf32, #tpu.memory_space<vmem>>, vector<104x128xf32>
    tpu.vector_store %arg8[%c0_19, %c0_20], %33 {strides = array<i32>} : memref<104x128xf32, #tpu.memory_space<vmem>>, vector<104x128xf32>,
    return
  }
  func.func @transform_0(%arg0: i32) -> (i32, i32) {
    %c0_i32 = arith.constant 0 : i32
    %c0_i32_0 = arith.constant 0 : i32
    return %arg0, %c0_i32 : i32, i32
  }
  func.func @transform_1(%arg0: i32) -> (i32, i32) {
    %c0_i32 = arith.constant 0 : i32
    %c0_i32_0 = arith.constant 0 : i32
    %c0_i32_1 = arith.constant 0 : i32
    return %c0_i32, %c0_i32_0 : i32, i32
  }
  func.func @transform_2(%arg0: i32) -> (i32, i32) {
    %c0_i32 = arith.constant 0 : i32
    %c0_i32_0 = arith.constant 0 : i32
    %c0_i32_1 = arith.constant 0 : i32
    return %c0_i32, %c0_i32_0 : i32, i32
  }
  func.func @transform_3(%arg0: i32) -> (i32, i32) {
    %c0_i32 = arith.constant 0 : i32
    %c0_i32_0 = arith.constant 0 : i32
    %c0_i32_1 = arith.constant 0 : i32
    return %c0_i32, %c0_i32_0 : i32, i32
  }
  func.func @transform_4(%arg0: i32) -> (i32, i32) {
    %c0_i32 = arith.constant 0 : i32
    %c0_i32_0 = arith.constant 0 : i32
    %c0_i32_1 = arith.constant 0 : i32
    return %c0_i32, %c0_i32_0 : i32, i32
  }
  func.func @transform_5(%arg0: i32) -> (i32, i32) {
    %c0_i32 = arith.constant 0 : i32
    %c0_i32_0 = arith.constant 0 : i32
    %c0_i32_1 = arith.constant 0 : i32
    return %c0_i32, %c0_i32_0 : i32, i32
  }
  func.func @transform_6(%arg0: i32) -> (i32, i32) {
    %c0_i32 = arith.constant 0 : i32
    %c0_i32_0 = arith.constant 0 : i32
    %c0_i32_1 = arith.constant 0 : i32
    return %c0_i32, %c0_i32_0 : i32, i32
  }
  func.func @transform_7(%arg0: i32) -> (i32, i32) {
    %c0_i32 = arith.constant 0 : i32
    %c0_i32_0 = arith.constant 0 : i32
    return %arg0, %c0_i32 : i32, i32
  }
}

module attributes {stable_mosaic.version = 11 : i64} {
  func.func @_mlp_kernel(%arg0: i32, %arg1: memref<104x32xf32, #tpu.memory_space<vmem>>, %arg2: memref<32x128xbf16, #tpu.memory_space<vmem>>, %arg3: memref<1x128xf32, #tpu.memory_space<vmem>>, %arg4: memref<128x128xbf16, #tpu.memory_space<vmem>>, %arg5: memref<1x128xf32, #tpu.memory_space<vmem>>, %arg6: memref<128x128xbf16, #tpu.memory_space<vmem>>, %arg7: memref<1x128xf32, #tpu.memory_space<vmem>>, %arg8: memref<104x128xf32, #tpu.memory_space<vmem>>) attributes {dimension_semantics = [#tpu.dimension_semantics<parallel>], iteration_bounds = array<i64: 2>, scalar_prefetch = 0 : i64, scratch_operands = 0 : i64, tpu.core_type = #tpu.core_type<tc>, window_params = [{transform_indices = @transform_0, window_bounds = array<i64: 104, 32>}, {pipeline_mode = #tpu.pipeline_mode<synchronous>, transform_indices = @transform_1, window_bounds = array<i64: 32, 128>}, {pipeline_mode = #tpu.pipeline_mode<synchronous>, transform_indices = @transform_2, window_bounds = array<i64: 1, 128>}, {pipeline_mode = #tpu.pipeline_mode<synchronous>, transform_indices = @transform_3, window_bounds = array<i64: 128, 128>}, {pipeline_mode = #tpu.pipeline_mode<synchronous>, transform_indices = @transform_4, window_bounds = array<i64: 1, 128>}, {pipeline_mode = #tpu.pipeline_mode<synchronous>, transform_indices = @transform_5, window_bounds = array<i64: 128, 128>}, {pipeline_mode = #tpu.pipeline_mode<synchronous>, transform_indices = @transform_6, window_bounds = array<i64: 1, 128>}, {transform_indices = @transform_7, window_bounds = array<i64: 104, 128>}]} {
    %c0 = arith.constant 0 : index
    %c0_0 = arith.constant 0 : index
    %0 = vector.load %arg1[%c0, %c0_0] : memref<104x32xf32, #tpu.memory_space<vmem>>, vector<104x32xf32>
    %1 = arith.truncf %0 : vector<104x32xf32> to vector<104x32xbf16>
    %c0_1 = arith.constant 0 : index
    %c0_2 = arith.constant 0 : index
    %2 = vector.load %arg2[%c0_1, %c0_2] : memref<32x128xbf16, #tpu.memory_space<vmem>>, vector<32x128xbf16>
    %cst = arith.constant dense<0.000000e+00> : vector<104x128xf32>
    %3 = tpu.matmul %1, %2, %cst {dimension_numbers = #tpu.dot_dimension_numbers<[1], [0], [0], [1], [0, 0, 1, 1], [], []>} : vector<104x32xbf16>, vector<32x128xbf16>, vector<104x128xf32> -> vector<104x128xf32>
    %c0_3 = arith.constant 0 : index
    %c0_4 = arith.constant 0 : index
    %4 = vector.load %arg3[%c0_3, %c0_4] : memref<1x128xf32, #tpu.memory_space<vmem>>, vector<1x128xf32>
    %5 = vector.broadcast %4 : vector<1x128xf32> to vector<104x128xf32>
    %6 = arith.addf %3, %5 : vector<104x128xf32>
    %cst_5 = arith.constant 0.000000e+00 : f32
    %7 = vector.broadcast %cst_5 : f32 to vector<104x128xf32>
    %8 = arith.subf %7, %6 : vector<104x128xf32>
    %9 = math.exp %8 : vector<104x128xf32>
    %cst_6 = arith.constant 1.000000e+00 : f32
    %10 = vector.broadcast %cst_6 : f32 to vector<104x128xf32>
    %11 = arith.addf %10, %9 : vector<104x128xf32>
    %12 = tpu.reciprocal %11 {approx = true} : vector<104x128xf32> -> vector<104x128xf32>
    %13 = arith.mulf %6, %12 : vector<104x128xf32>
    %14 = arith.truncf %13 : vector<104x128xf32> to vector<104x128xbf16>
    %c0_7 = arith.constant 0 : index
    %c0_8 = arith.constant 0 : index
    %15 = vector.load %arg4[%c0_7, %c0_8] : memref<128x128xbf16, #tpu.memory_space<vmem>>, vector<128x128xbf16>
    %cst_9 = arith.constant dense<0.000000e+00> : vector<104x128xf32>
    %16 = tpu.matmul %14, %15, %cst_9 {dimension_numbers = #tpu.dot_dimension_numbers<[1], [0], [0], [1], [0, 0, 1, 1], [], []>} : vector<104x128xbf16>, vector<128x128xbf16>, vector<104x128xf32> -> vector<104x128xf32>
    %c0_10 = arith.constant 0 : index
    %c0_11 = arith.constant 0 : index
    %17 = vector.load %arg5[%c0_10, %c0_11] : memref<1x128xf32, #tpu.memory_space<vmem>>, vector<1x128xf32>
    %18 = vector.broadcast %17 : vector<1x128xf32> to vector<104x128xf32>
    %19 = arith.addf %16, %18 : vector<104x128xf32>
    %cst_12 = arith.constant 0.000000e+00 : f32
    %20 = vector.broadcast %cst_12 : f32 to vector<104x128xf32>
    %21 = arith.subf %20, %19 : vector<104x128xf32>
    %22 = math.exp %21 : vector<104x128xf32>
    %cst_13 = arith.constant 1.000000e+00 : f32
    %23 = vector.broadcast %cst_13 : f32 to vector<104x128xf32>
    %24 = arith.addf %23, %22 : vector<104x128xf32>
    %25 = tpu.reciprocal %24 {approx = true} : vector<104x128xf32> -> vector<104x128xf32>
    %26 = arith.mulf %19, %25 : vector<104x128xf32>
    %27 = arith.truncf %26 : vector<104x128xf32> to vector<104x128xbf16>
    %c0_14 = arith.constant 0 : index
    %c0_15 = arith.constant 0 : index
    %28 = vector.load %arg6[%c0_14, %c0_15] : memref<128x128xbf16, #tpu.memory_space<vmem>>, vector<128x128xbf16>
    %cst_16 = arith.constant dense<0.000000e+00> : vector<104x128xf32>
    %29 = tpu.matmul %27, %28, %cst_16 {dimension_numbers = #tpu.dot_dimension_numbers<[1], [0], [0], [1], [0, 0, 1, 1], [], []>} : vector<104x128xbf16>, vector<128x128xbf16>, vector<104x128xf32> -> vector<104x128xf32>
    %c0_17 = arith.constant 0 : index
    %c0_18 = arith.constant 0 : index
    %30 = vector.load %arg7[%c0_17, %c0_18] : memref<1x128xf32, #tpu.memory_space<vmem>>, vector<1x128xf32>
    %31 = vector.broadcast %30 : vector<1x128xf32> to vector<104x128xf32>
    %32 = arith.addf %29, %31 : vector<104x128xf32>
    %33 = math.tanh %32 : vector<104x128xf32>
    %c0_19 = arith.constant 0 : index
    %c0_20 = arith.constant 0 : index
    %34 = vector.load %arg8[%c0_19, %c0_20] : memref<104x128xf32, #tpu.memory_space<vmem>>, vector<104x128xf32>
    tpu.vector_store %arg8[%c0_19, %c0_20], %33 {strides = array<i32>} : memref<104x128xf32, #tpu.memory_space<vmem>>, vector<104x128xf32>,
    return
  }
  func.func @transform_0(%arg0: i32) -> (i32, i32) {
    %c0_i32 = arith.constant 0 : i32
    %c0_i32_0 = arith.constant 0 : i32
    return %arg0, %c0_i32 : i32, i32
  }
  func.func @transform_1(%arg0: i32) -> (i32, i32) {
    %c0_i32 = arith.constant 0 : i32
    %c0_i32_0 = arith.constant 0 : i32
    %c0_i32_1 = arith.constant 0 : i32
    return %c0_i32, %c0_i32_0 : i32, i32
  }
  func.func @transform_2(%arg0: i32) -> (i32, i32) {
    %c0_i32 = arith.constant 0 : i32
    %c0_i32_0 = arith.constant 0 : i32
    %c0_i32_1 = arith.constant 0 : i32
    return %c0_i32, %c0_i32_0 : i32, i32
  }
  func.func @transform_3(%arg0: i32) -> (i32, i32) {
    %c0_i32 = arith.constant 0 : i32
    %c0_i32_0 = arith.constant 0 : i32
    %c0_i32_1 = arith.constant 0 : i32
    return %c0_i32, %c0_i32_0 : i32, i32
  }
  func.func @transform_4(%arg0: i32) -> (i32, i32) {
    %c0_i32 = arith.constant 0 : i32
    %c0_i32_0 = arith.constant 0 : i32
    %c0_i32_1 = arith.constant 0 : i32
    return %c0_i32, %c0_i32_0 : i32, i32
  }
  func.func @transform_5(%arg0: i32) -> (i32, i32) {
    %c0_i32 = arith.constant 0 : i32
    %c0_i32_0 = arith.constant 0 : i32
    %c0_i32_1 = arith.constant 0 : i32
    return %c0_i32, %c0_i32_0 : i32, i32
  }
  func.func @transform_6(%arg0: i32) -> (i32, i32) {
    %c0_i32 = arith.constant 0 : i32
    %c0_i32_0 = arith.constant 0 : i32
    %c0_i32_1 = arith.constant 0 : i32
    return %c0_i32, %c0_i32_0 : i32, i32
  }
  func.func @transform_7(%arg0: i32) -> (i32, i32) {
    %c0_i32 = arith.constant 0 : i32
    %c0_i32_0 = arith.constant 0 : i32
    return %arg0, %c0_i32 : i32, i32
  }
}

</mosaic_0001>

<bundles_post_ra>
// kernel: tpu_custom_call.1
= control target key start
LH: loop header
LB: loop body
LE: loop exit
PB: predicated region body
PF: predicated region fallthrough
CT: control target
= control target key end

     0   :  { %12 = vsyncpa [#allocation3], 0  ;;  %s1911_s0 = inlined_call_operand.vmem [shape: f32[208,32], index: 0, kind: input, shape index: {}]   ;;  %s1912_s1 = inlined_call_operand.vmem [shape: bf16[32,128], index: 1, kind: input, shape index: {}]   ;;  %s1913_s2 = inlined_call_operand.vmem [shape: f32[1,128], index: 2, kind: input, shape index: {}]   ;;  %s1914_s3 = inlined_call_operand.vmem [shape: bf16[128,128], index: 3, kind: input, shape index: {}]   ;;  %s1915_s4 = inlined_call_operand.vmem [shape: f32[1,128], index: 4, kind: input, shape index: {}]   ;;  %s1916_s5 = inlined_call_operand.vmem [shape: bf16[128,128], index: 5, kind: input, shape index: {}]   ;;  %s1917_s6 = inlined_call_operand.vmem [shape: f32[1,128], index: 6, kind: input, shape index: {}]   ;;  %s1918_s7 = inlined_call_operand.hbm [shape: f32[208,128], index: 7, kind: output, shape index: {}]  }
   0x1   :  { %14 = vsyncpa [#allocation3 + $0x1], 0  ;;  %s1525_s24 = smov 0   ;;  %s1527_s25 = smov 0  }
   0x2   :  { %s1529_s26 = smov 0   ;;  %s1531_s27 = smov 0  }
   0x3 LB: > { %s1546_s28 = sadd.s32 4294967295, %s1478_s27   ;;  %s1024_s29 = sadd.s32 4294967294, %s1478_s27   ;;  %s1478_s27 = sphi %s1531_s27, %s1924_s27   ;;  %s1474_s26 = sphi %s1529_s26, %s1923_s26   ;;  %s1470_s25 = sphi %s1527_s25, %s1922_s25   ;;  %s1466_s24 = sphi %s1525_s24, %s1921_s24  }
   0x4   : > { %s1550_s30 = sadd.s32 1, %s1478_s27   ;;  %s179_s8 = sadd.s32 1, %s1474_s26 }
   0x5   : > { %s176_s9 = ssub.s32 %s1478_s27, %s1550_s30  ;;  %p189_p0 = scmp.ne.s32.totalorder %s1474_s26, %s1470_s25 }
   0x6   : > { %p177_p1 = scmp.eq.s32.totalorder %s176_s9, 0  ;;  %p190_p2 = scmp.eq.s32.totalorder %s1546_s28, 1 }
   0x7   : > { %p195_p3 = scmp.ne.s32.totalorder %s1470_s25, %s1466_s24  ;;  %p196_p4 = scmp.eq.s32.totalorder %s1024_s29, 1 }
   0x8   : > { %s1561_s10 = scalar_select %p177_p1, %s1474_s26, %s179_s8  }
   0x9   : > { %p1563_p5 = por %p190_p2, %p189_p0  ;;  %p1567_p6 = por %p196_p4, %p195_p3 }
   0xa   : > { %p1027_p7 = scmp.ge.s32.totalorder %s1478_s27, 1  ;;  %p241_p8 = scmp.lt.s32.totalorder %s1478_s27, 3 }
   0xc   : > { %p242_p9 = pnand %p1027_p7, %p241_p8 }
   0xd   : > { %v1268_v0 = vld [vmem:[%s1912_s1] sm:$0xff] (!%p242_p9)   ;;  %v1480_v1 = vmov (!%p242_p9), 0.0   ;;  %v1269_v2 = vld [vmem:[%s1912_s1 + $0x8] sm:$0xff] (!%p242_p9)   ;;  %s273_s17 = smul.u32 (!%p242_p9), 13, %s1546_s28  ;;  %vm1481_vm0 = vmmov (!%p242_p9), 0   ;;  %vm324_vm1 = vcmask (!%p242_p9), 261120  }
   0xe   : > { %245 = sbr.rel (%p242_p9) target bundleno = 812 (0x32c), region = 48  ;;  %1100 = vmatprep.subr.bf16.mxu0 (!%p242_p9), %v1480_v1  ;;  %1220 = vmatprep.subr.bf16.mxu1 (!%p242_p9), %v1480_v1  ;;  %v1270_v23 = vld [vmem:[%s1914_s3] sm:$0xff] (!%p242_p9)   ;;  %v1271_v24 = vld [vmem:[%s1914_s3 + $0x8] sm:$0xff] (!%p242_p9)   ;;  %v1272_v25 = vld [vmem:[%s1914_s3 + $0x10] sm:$0xff] (!%p242_p9)  }
   0xf   : > { %1101 = vmatpush3.bf16.msra.mxu0 (!%p242_p9), %v1268_v0  ;;  %1222 = vmatpush3.bf16.msra.mxu1 (!%p242_p9), %v1268_v0  ;;  %p274_p10 = scmp.lt.s32.totalorder (!%p242_p9), %s273_s17, 25  ;;  %v1273_v26 = vld [vmem:[%s1914_s3 + $0x18] sm:$0xff] (!%p242_p9)   ;;  %v1274_v27 = vld [vmem:[%s1914_s3 + $0x20] sm:$0xff] (!%p242_p9)   ;;  %v1275_v28 = vld [vmem:[%s1914_s3 + $0x28] sm:$0xff] (!%p242_p9)  }
  0x10   : > { %1102 = vmatprep.subr.bf16.mxu0 (!%p242_p9), %v1480_v1  ;;  %1221 = vmatprep.subr.bf16.mxu1 (!%p242_p9), %v1480_v1  ;;  %v1276_v29 = vld [vmem:[%s1914_s3 + $0x30] sm:$0xff] (!%p242_p9)   ;;  %v1277_v30 = vld [vmem:[%s1914_s3 + $0x38] sm:$0xff] (!%p242_p9)   ;;  %v1648_v31 = vld [vmem:[%s1913_s2] ss:$0 sm:$0xff] (!%p242_p9) }
  0x11   : > { %1104 = vmatprep.mubr.msk.bf16.mxu0 (!%p242_p9), %vm1481_vm0, %v1480_v1  ;;  %1120 = vmatprep.mubr.msk.bf16.mxu1 (!%p242_p9), %vm1481_vm0, %v1480_v1 }
  0x13   : > { %1103 = vmatpush3.bf16.msra.mxu0 (!%p242_p9), %v1269_v2  ;;  %1223 = vmatpush3.bf16.msra.mxu1 (!%p242_p9), %v1269_v2 }
  0x14   : > { %1132 = vmatprep.subr.bf16.mxu1 (!%p242_p9), %v1480_v1  ;;  %1176 = vmatprep.subr.bf16.mxu0 (!%p242_p9), %v1480_v1 }
  0x15   : > { %s1926_s17 = smov (!%p274_p10, %s273_s17), 25 }
  0x16   : > { %s1028_s18 = sshll.u32 %s1926_s17, 3 }
  0x17   : > { %s277_s21 = scalar_lea.vmem %s1911_s0, %s1028_s18  ;;  %s270_s18 = sand.u32 1, %s1470_s25  }
  0x18   : > { %v281_v3 = vld [vmem:[%s277_s21] sm:$0xff]  ;;  %v282_v4 = vld [vmem:[%s277_s21 + $0x8] sm:$0xff]  ;;  %v283_v9 = vld [vmem:[%s277_s21 + $0x10] sm:$0xff]  ;;  %s1224_s19 = smul.u32 104, %s270_s18  ;;  %s1870_s9 = scalar_lea.sflag [#allocation3], %s270_s18 }
  0x19   : > { %v289_v5 = vld [vmem:[%s277_s21 + $0x40] sm:$0xff]  ;;  %v294_v6 = vpack.c.bf16 %v282_v4, %v281_v3  ;;  %v290_v7 = vld [vmem:[%s277_s21 + $0x48] sm:$0xff]  ;;  %v284_v10 = vld [vmem:[%s277_s21 + $0x18] sm:$0xff] }
  0x1a   : > { %v298_v8 = vpack.c.bf16 %v290_v7, %v289_v5  ;;  %v291_v11 = vld [vmem:[%s277_s21 + $0x50] sm:$0xff]  ;;  %v292_v12 = vld [vmem:[%s277_s21 + $0x58] sm:$0xff]  ;;  %v295_v13 = vpack.c.bf16 %v284_v10, %v283_v9  ;;  %v285_v15 = vld [vmem:[%s277_s21 + $0x20] sm:$0xff]  ;;  %s1835_s20 = scalar_lea.vmem [#allocation2], %s1224_s19 }
  0x1b   : > { %1105 = vmatmul.mubr.msk.bf16.vlgmr.msra.gmra.mrb[0].mxu0 %vm324_vm1, %v294_v6  ;;  %v299_v14 = vpack.c.bf16 %v292_v12, %v291_v11  ;;  %v286_v16 = vld [vmem:[%s277_s21 + $0x28] sm:$0xff]  ;;  %v293_v17 = vld [vmem:[%s277_s21 + $0x60] sm:$0xff]  ;;  %v287_v20 = vld [vmem:[%s277_s21 + $0x30] sm:$0xff]  ;;  %s962_s22 = sshll.u32 %s1835_s20, 4  ;;  %s1865_s22 = int_to_ptr.vmem [resolvable:$true] %s962_s22 }
  0x1c   : > { %1121 = vmatmul.mubr.msk.bf16.vlgmr.msra.gmra.mrb[0].mxu1 %vm324_vm1, %v298_v8  ;;  %1108 = vmatprep.mubr.msk.bf16.mxu0 %vm1481_vm0, %v1480_v1  ;;  %v296_v18 = vpack.c.bf16 %v286_v16, %v285_v15  ;;  %v300_v19 = vpack.c.bf16 %v293_v17, %v293_v17  ;;  %v288_v21 = vld [vmem:[%s277_s21 + $0x38] sm:$0xff]  ;;  %s1060_s21 = smul.u32 1664, %s1546_s28  ;;  %s1416_s13 = scalar_lea.vmem %s1865_s22, 1664 }
  0x1d   : > { %1124 = vmatprep.mubr.msk.bf16.mxu1 %vm1481_vm0, %v1480_v1  ;;  %v297_v22 = vpack.c.bf16 %v288_v21, %v287_v20  ;;  %1133 = vmatpush3.bf16.msra.mxu1 %v1270_v23  ;;  %p1417_p11 = scmp.ne.s32.totalorder %s1865_s22, %s1416_s13  ;;  %s1482_s28 = smov [#allocation2]  }
  0x1e   : > { %1134 = vmatprep.subr.bf16.mxu1 %v1480_v1  ;;  %s1863_s8 = scalar_lea.hbm %s1918_s7, %s1060_s21  ;;  %s1420_s14 = sshll.u32 %s1482_s28, 4  ;;  %s1421_s14 = int_to_ptr.vmem [resolvable:$false] %s1420_s14 }
  0x1f   : > { %p1418_p12 = pnand %p1417_p11, %p1563_p5  ;;  %s1422_s15 = scalar_lea.vmem %s1421_s14, 3328 }
  0x20   : > { %p1423_p0 = scmp.lt.s32.totalorder %s1865_s22, %s1421_s14  ;;  %p1424_p1 = scmp.lt.s32.totalorder %s1422_s15, %s1416_s13 }
  0x21   : > { %1135 = vmatpush3.bf16.msra.mxu1 %v1271_v24  ;;  %p1419_p13 = pneg %p1418_p12 }
  0x22   : > { %1136 = vmatprep.subr.bf16.mxu1 %v1480_v1  ;;  %p1425_p2 = por %p1424_p1, %p1423_p0 }
  0x23   : > { %1109 = vmatmul.mubr.msk.bf16.gmra.mrb[4].mxu0 %vm324_vm1, %v295_v13 }
  0x24   : > { %1125 = vmatmul.mubr.msk.bf16.gmra.mrb[4].mxu1 %vm324_vm1, %v299_v14  ;;  %1112 = vmatprep.mubr.msk.bf16.mxu0 %vm1481_vm0, %v1480_v1  ;;  %p1426_p3 = pnand %p1425_p2, %p1419_p13 }
  0x25   : > { %1128 = vmatprep.mubr.msk.bf16.mxu1 %vm1481_vm0, %v1480_v1  ;;  %1137 = vmatpush3.bf16.msra.mxu1 %v1272_v25 }
  0x26   : > { %1138 = vmatprep.subr.bf16.mxu1 %v1480_v1 }
  0x29   : > { %1139 = vmatpush3.bf16.msra.mxu1 %v1273_v26 }
  0x2a   : > { %1140 = vmatprep.subr.bf16.mxu1 %v1480_v1 }
  0x2b   : > { %1113 = vmatmul.mubr.msk.bf16.gmra.mrb[8].mxu0 %vm324_vm1, %v296_v18 }
  0x2c   : > { %1116 = vmatprep.mubr.msk.bf16.mxu0 %vm1481_vm0, %v1480_v1  ;;  %1129 = vmatmul.mubr.msk.bf16.gmra.mrb[8].mxu1 %vm324_vm1, %v300_v19 }
  0x2d   : > { %1148 = vmatprep.mubr.msk.bf16.mxu1 %vm1481_vm0, %v1480_v1  ;;  %1141 = vmatpush3.bf16.msra.mxu1 %v1274_v27 }
  0x2e   : > { %1142 = vmatprep.subr.bf16.mxu1 %v1480_v1 }
  0x31   : > { %1143 = vmatpush3.bf16.msra.mxu1 %v1275_v28 }
  0x32   : > { %1144 = vmatprep.subr.bf16.mxu1 %v1480_v1 }
  0x33   : > { %1117 = vmatmul.mubr.msk.bf16.gmra.mrb[12].mxu0 %vm324_vm1, %v297_v22 }
  0x34   : > { %1192 = vmatprep.mubr.msk.bf16.mxu0 %vm1481_vm0, %v1480_v1 }
  0x35   : > { %1145 = vmatpush3.bf16.msra.mxu1 %v1276_v29 }
  0x36   : > { %1146 = vmatprep.subr.bf16.mxu1 %v1480_v1 }
  0x39   : > { %1147 = vmatpush3.bf16.msra.mxu1 %v1277_v30 }
  0xee   : > { %v380_v32 = vpop.f32.mrb[0].mxu0 }
  0xef   : > { %v1651_v33 = vadd.f32 %v1648_v31, %v380_v32  ;;  %v1106_v34 = vpop.f32.mrb[1].mxu0  ;;  %v412_v35 = vpop.f32.mrb[0].mxu1 }
  0xf0   : > { %v383_v36 = vpop.f32.mrb[2].mxu0  ;;  %v1654_v37 = vadd.f32 %v1648_v31, %v412_v35  ;;  %v1122_v38 = vpop.f32.mrb[1].mxu1 }
  0xf1   : > { %v434_v39 = vsub.f32 0.0, %v1651_v33  ;;  %v1658_v40 = vadd.f32 %v1648_v31, %v383_v36  ;;  %v1107_v41 = vpop.f32.mrb[3].mxu0  ;;  %v415_v42 = vpop.f32.mrb[2].mxu1 }
  0xf2   : > { %v442_v43 = vsub.f32 0.0, %v1654_v37  ;;  %v1662_v44 = vadd.f32 %v1648_v31, %v415_v42  ;;  %v1123_v45 = vpop.f32.mrb[3].mxu1 }
  0xf3   : > { %v447_v46 = vmul.f32 1.442695, %v434_v39  ;;  %v435_v47 = vsub.f32 0.0, %v1658_v40 }
  0xf4   : > { %v463_v48 = vmul.f32 1.442695, %v442_v43  ;;  %v443_v49 = vsub.f32 0.0, %v1662_v44 }
  0xf5   : > { %1286 = vpow2.f32 %v447_v46  ;;  %v449_v50 = vmul.f32 1.442695, %v435_v47 }
  0xf6   : > { %1288 = vpow2.f32 %v463_v48  ;;  %v465_v51 = vmul.f32 1.442695, %v443_v49  ;;  %v388_v52 = vpop.f32.mrb[4].mxu0 }
  0xf7   : > { %1290 = vpow2.f32 %v449_v50  ;;  %v1667_v53 = vadd.f32 %v1648_v31, %v388_v52  ;;  %v1110_v54 = vpop.f32.mrb[5].mxu0  ;;  %v420_v55 = vpop.f32.mrb[4].mxu1 }
  0xf8   : > { %1292 = vpow2.f32 %v465_v51  ;;  %v391_v56 = vpop.f32.mrb[6].mxu0  ;;  %v1670_v57 = vadd.f32 %v1648_v31, %v420_v55  ;;  %v1126_v58 = vpop.f32.mrb[5].mxu1 }
  0xf9   : > { %v436_v59 = vsub.f32 0.0, %v1667_v53  ;;  %v1674_v60 = vadd.f32 %v1648_v31, %v391_v56  ;;  %v1111_v61 = vpop.f32.mrb[7].mxu0  ;;  %v423_v62 = vpop.f32.mrb[6].mxu1 }
  0xfa   : > { %v444_v63 = vsub.f32 0.0, %v1670_v57  ;;  %v1678_v0 = vadd.f32 %v1648_v31, %v423_v62  ;;  %v1127_v2 = vpop.f32.mrb[7].mxu1 }
  0xfb   : > { %v451_v3 = vmul.f32 1.442695, %v436_v59  ;;  %v437_v4 = vsub.f32 0.0, %v1674_v60 }
  0xfc   : > { %v467_v5 = vmul.f32 1.442695, %v444_v63  ;;  %v445_v6 = vsub.f32 0.0, %v1678_v0 }
  0xfd   : > { %1294 = vpow2.f32 %v451_v3  ;;  %v453_v7 = vmul.f32 1.442695, %v437_v4 }
  0xfe   : > { %1296 = vpow2.f32 %v467_v5  ;;  %v469_v8 = vmul.f32 1.442695, %v445_v6  ;;  %v396_v9 = vpop.f32.mrb[8].mxu0 }
  0xff   : > { %v1287_v10 = vpop.eup %1286  ;;  %1298 = vpow2.f32 %v453_v7  ;;  %v1683_v11 = vadd.f32 %v1648_v31, %v396_v9  ;;  %v1114_v12 = vpop.f32.mrb[9].mxu0 }
 0x100   : > { %v1685_v13 = vpop.f32.mrb[8].mxu1  ;;  %v1289_v14 = vpop.eup %1288  ;;  %v473_v15 = vadd.f32 1.0, %v1287_v10  ;;  %1300 = vpow2.f32 %v469_v8 }
 0x101   : > { %v399_v16 = vpop.f32.mrb[10].mxu0  ;;  %v1130_v17 = vpop.f32.mrb[9].mxu1  ;;  %v481_v19 = vadd.f32 1.0, %v1289_v14  ;;  %v438_v20 = vsub.f32 0.0, %v1683_v11  ;;  %v429_v9 = vadd.f32 %v1648_v31, %v1685_v13 }
 0x102   : > { %v1291_v18 = vpop.eup %1290  ;;  %v1689_v21 = vadd.f32 %v1648_v31, %v399_v16  ;;  %v1115_v22 = vpop.f32.mrb[11].mxu0  ;;  %1302 = vrcp.f32 %v473_v15 }
 0x103   : > { %v431_v23 = vpop.f32.mrb[10].mxu1  ;;  %v1293_v24 = vpop.eup %1292  ;;  %v474_v25 = vadd.f32 1.0, %v1291_v18  ;;  %1304 = vrcp.f32 %v481_v19  ;;  %v455_v28 = vmul.f32 1.442695, %v438_v20  ;;  %v446_v15 = vsub.f32 0.0, %v429_v9 }
 0x104   : > { %v1131_v26 = vpop.f32.mrb[11].mxu1  ;;  %v482_v27 = vadd.f32 1.0, %v1293_v24  ;;  %v439_v29 = vsub.f32 0.0, %v1689_v21 }
 0x105   : > { %1306 = vrcp.f32 %v474_v25  ;;  %v471_v22 = vmul.f32 1.442695, %v446_v15 }
 0x106   : > { %1308 = vrcp.f32 %v482_v27  ;;  %v457_v30 = vmul.f32 1.442695, %v439_v29  ;;  %v404_v32 = vpop.f32.mrb[12].mxu0 }
 0x107   : > { %1310 = vpow2.f32 %v455_v28  ;;  %v1295_v34 = vpop.eup %1294  ;;  %v1693_v35 = vadd.f32 %v1648_v31, %v404_v32  ;;  %v1118_v36 = vpop.f32.mrb[13].mxu0 }
 0x108   : > { %1312 = vpow2.f32 %v457_v30  ;;  %v1297_v38 = vpop.eup %1296  ;;  %v475_v39 = vadd.f32 1.0, %v1295_v34  ;;  %v407_v41 = vpop.f32.mrb[14].mxu0  ;;  %v1278_v34 = vld [vmem:[%s1916_s5] sm:$0xff]   ;;  %v1280_v36 = vld [vmem:[%s1916_s5 + $0x10] sm:$0xff]  }
 0x109   : > { %v1299_v42 = vpop.eup %1298  ;;  %v483_v43 = vadd.f32 1.0, %v1297_v38  ;;  %v440_v45 = vsub.f32 0.0, %v1693_v35  ;;  %v1697_v46 = vadd.f32 %v1648_v31, %v407_v41  ;;  %v1119_v47 = vpop.f32.mrb[15].mxu0  ;;  %1177 = vmatpush3.bf16.msra.mxu0 %v1278_v34  ;;  %v1281_v38 = vld [vmem:[%s1916_s5 + $0x18] sm:$0xff]   ;;  %v1283_v41 = vld [vmem:[%s1916_s5 + $0x28] sm:$0xff]  }
 0x10a   : > { %v1301_v48 = vpop.eup %1300  ;;  %1314 = vrcp.f32 %v475_v39  ;;  %v476_v49 = vadd.f32 1.0, %v1299_v42  ;;  %1178 = vmatprep.subr.bf16.mxu0 %v1480_v1  ;;  %v1282_v39 = vld [vmem:[%s1916_s5 + $0x20] sm:$0xff]   ;;  %v1284_v42 = vld [vmem:[%s1916_s5 + $0x30] sm:$0xff]  }
 0x10b   : > { %1316 = vrcp.f32 %v483_v43  ;;  %v484_v50 = vadd.f32 1.0, %v1301_v48  ;;  %v459_v51 = vmul.f32 1.442695, %v440_v45  ;;  %v441_v52 = vsub.f32 0.0, %v1697_v46  ;;  %v1285_v43 = vld [vmem:[%s1916_s5 + $0x38] sm:$0xff]  }
 0x10c   : > { %v1303_v54 = vpop.eup %1302  ;;  %1318 = vrcp.f32 %v476_v49  ;;  %v1760_v45 = vld [vmem:[%s1915_s4] ss:$0 sm:$0xff] }
 0x10d   : > { %v1305_v55 = vpop.eup %1304  ;;  %1320 = vrcp.f32 %v484_v50  ;;  %v461_v56 = vmul.f32 1.442695, %v441_v52  ;;  %v499_v62 = vmul.f32 %v1303_v54, %v1651_v33 }
 0x10e   : > { %v507_v59 = vmul.f32 %v1305_v55, %v1654_v37  ;;  %1322 = vpow2.f32 %v459_v51 }
 0x10f   : > { %v1307_v58 = vpop.eup %1306  ;;  %1324 = vpow2.f32 %v461_v56 }
 0x110   : > { %v1309_v61 = vpop.eup %1308  ;;  %v500_v63 = vmul.f32 %v1307_v58, %v1658_v40 }
 0x111   : > { %v1311_v2 = vpop.eup %1310  ;;  %v508_v3 = vmul.f32 %v1309_v61, %v1662_v44 }
 0x112   : > { %v1313_v4 = vpop.eup %1312  ;;  %v512_v5 = vpack.c.bf16 %v500_v63, %v499_v62  ;;  %v477_v6 = vadd.f32 1.0, %v1311_v2 }
 0x113   : > { %v478_v7 = vadd.f32 1.0, %v1313_v4  ;;  %v516_v8 = vpack.c.bf16 %v508_v3, %v507_v59 }
 0x114   : > { %1326 = vrcp.f32 %v477_v6  ;;  %1149 = vmatmul.mubr.bf16.vlgmr.msra.gmra.mrb[12].mxu1 %v512_v5  ;;  %v1315_v37 = vpop.eup %1314 }
 0x115   : > { %1328 = vrcp.f32 %v478_v7  ;;  %1152 = vmatprep.mubr.msk.bf16.mxu1 %vm1481_vm0, %v1480_v1  ;;  %v1317_v33 = vpop.eup %1316  ;;  %v501_v12 = vmul.f32 %v1315_v37, %v1667_v53 }
 0x116   : > { %v1319_v40 = vpop.eup %1318  ;;  %v509_v10 = vmul.f32 %v1317_v33, %v1670_v57 }
 0x117   : > { %v1321_v44 = vpop.eup %1320  ;;  %v502_v14 = vmul.f32 %v1319_v40, %v1674_v60 }
 0x118   : > { %v1323_v16 = vpop.eup %1322  ;;  %v510_v17 = vmul.f32 %v1321_v44, %v1678_v0 }
 0x119   : > { %v1325_v31 = vpop.eup %1324  ;;  %v479_v13 = vadd.f32 1.0, %v1323_v16  ;;  %v513_v18 = vpack.c.bf16 %v502_v14, %v501_v12 }
 0x11a   : > { %v480_v19 = vadd.f32 1.0, %v1325_v31  ;;  %v517_v20 = vpack.c.bf16 %v510_v17, %v509_v10 }
 0x11b   : > { %1330 = vrcp.f32 %v479_v13 }
 0x11c   : > { %1153 = vmatmul.mubr.bf16.gmra.mrb[16].mxu1 %v513_v18  ;;  %1332 = vrcp.f32 %v480_v19 }
 0x11d   : > { %1156 = vmatprep.mubr.msk.bf16.mxu1 %vm1481_vm0, %v1480_v1  ;;  %1334 = vpow2.f32 %v471_v22 }
 0x11e   : > { %v1327_v57 = vpop.eup %1326 }
 0x11f   : > { %v1329_v53 = vpop.eup %1328  ;;  %v503_v60 = vmul.f32 %v1327_v57, %v1683_v11 }
 0x120   : > { %v504_v23 = vmul.f32 %v1329_v53, %v1689_v21 }
 0x122   : > { %v514_v0 = vpack.c.bf16 %v504_v23, %v503_v60 }
 0x124   : > { %1157 = vmatmul.mubr.bf16.gmra.mrb[20].mxu1 %v514_v0 }
 0x125   : > { %1160 = vmatprep.mubr.msk.bf16.mxu1 %vm1481_vm0, %v1480_v1  ;;  %v1331_v24 = vpop.eup %1330 }
 0x126   : > { %v1333_v25 = vpop.eup %1332  ;;  %v505_v26 = vmul.f32 %v1331_v24, %v1693_v35  ;;  %v1279_v35 = vld [vmem:[%s1916_s5 + $0x8] sm:$0xff]  }
 0x127   : > { %v506_v27 = vmul.f32 %v1333_v25, %v1697_v46  ;;  %v1335_v28 = vpop.eup %1334  ;;  %1179 = vmatpush3.bf16.msra.mxu0 %v1279_v35 }
 0x128   : > { %v485_v30 = vadd.f32 1.0, %v1335_v28  ;;  %1180 = vmatprep.subr.bf16.mxu0 %v1480_v1 }
 0x129   : > { %v515_v29 = vpack.c.bf16 %v506_v27, %v505_v26 }
 0x12a   : > { %1336 = vrcp.f32 %v485_v30 }
 0x12b   : > { %1181 = vmatpush3.bf16.msra.mxu0 %v1280_v36 }
 0x12c   : > { %1161 = vmatmul.mubr.bf16.gmra.mrb[24].mxu1 %v515_v29  ;;  %1182 = vmatprep.subr.bf16.mxu0 %v1480_v1 }
 0x12d   : > { %1164 = vmatprep.mubr.msk.bf16.mxu1 %vm1481_vm0, %v1480_v1 }
 0x12f   : > { %1183 = vmatpush3.bf16.msra.mxu0 %v1281_v38 }
 0x130   : > { %1184 = vmatprep.subr.bf16.mxu0 %v1480_v1 }
 0x133   : > { %1185 = vmatpush3.bf16.msra.mxu0 %v1282_v39 }
 0x134   : > { %1165 = vmatmul.mubr.bf16.gmra.mrb[28].mxu1 %v516_v8  ;;  %v1337_v11 = vpop.eup %1336  ;;  %1186 = vmatprep.subr.bf16.mxu0 %v1480_v1 }
 0x135   : > { %1168 = vmatprep.mubr.msk.bf16.mxu1 %vm1481_vm0, %v1480_v1  ;;  %v511_v21 = vmul.f32 %v1337_v11, %v429_v9 }
 0x137   : > { %v518_v32 = vpack.c.bf16 %v511_v21, %v511_v21  ;;  %1187 = vmatpush3.bf16.msra.mxu0 %v1283_v41 }
 0x138   : > { %1188 = vmatprep.subr.bf16.mxu0 %v1480_v1 }
 0x13b   : > { %1189 = vmatpush3.bf16.msra.mxu0 %v1284_v42 }
 0x13c   : > { %1169 = vmatmul.mubr.bf16.gmra.mrb[32].mxu1 %v517_v20  ;;  %1190 = vmatprep.subr.bf16.mxu0 %v1480_v1 }
 0x13d   : > { %1172 = vmatprep.mubr.msk.bf16.mxu1 %vm1481_vm0, %v1480_v1 }
 0x13f   : > { %1191 = vmatpush3.bf16.msra.mxu0 %v1285_v43 }
 0x144   : > { %1173 = vmatmul.mubr.bf16.gmra.mrb[36].mxu1 %v518_v32 }
 0x1e7   : > { %v624_v46 = vpop.f32.mrb[12].mxu1 }
 0x1e8   : > { %v625_v47 = vadd.f32 %v1760_v45, %v624_v46  ;;  %v1150_v48 = vpop.f32.mrb[13].mxu1 }
 0x1e9   : > { %v627_v49 = vpop.f32.mrb[14].mxu1 }
 0x1ea   : > { %v678_v50 = vsub.f32 0.0, %v625_v47  ;;  %v628_v51 = vadd.f32 %v1760_v45, %v627_v49  ;;  %v1151_v52 = vpop.f32.mrb[15].mxu1 }
 0x1ec   : > { %v691_v54 = vmul.f32 1.442695, %v678_v50  ;;  %v679_v55 = vsub.f32 0.0, %v628_v51 }
 0x1ee   : > { %1338 = vpow2.f32 %v691_v54  ;;  %v693_v56 = vmul.f32 1.442695, %v679_v55 }
 0x1ef   : > { %v632_v58 = vpop.f32.mrb[16].mxu1 }
 0x1f0   : > { %1340 = vpow2.f32 %v693_v56  ;;  %v1765_v59 = vadd.f32 %v1760_v45, %v632_v58  ;;  %v1154_v61 = vpop.f32.mrb[17].mxu1 }
 0x1f1   : > { %v635_v62 = vpop.f32.mrb[18].mxu1 }
 0x1f2   : > { %v680_v63 = vsub.f32 0.0, %v1765_v59  ;;  %v1769_v2 = vadd.f32 %v1760_v45, %v635_v62  ;;  %v1155_v3 = vpop.f32.mrb[19].mxu1 }
 0x1f4   : > { %v695_v4 = vmul.f32 1.442695, %v680_v63  ;;  %v681_v5 = vsub.f32 0.0, %v1769_v2 }
 0x1f6   : > { %1342 = vpow2.f32 %v695_v4  ;;  %v697_v6 = vmul.f32 1.442695, %v681_v5 }
 0x1f7   : > { %v640_v7 = vpop.f32.mrb[20].mxu1 }
 0x1f8   : > { %v1339_v8 = vpop.eup %1338  ;;  %1344 = vpow2.f32 %v697_v6  ;;  %v1773_v9 = vadd.f32 %v1760_v45, %v640_v7  ;;  %v1158_v37 = vpop.f32.mrb[21].mxu1 }
 0x1f9   : > { %v717_v33 = vadd.f32 1.0, %v1339_v8  ;;  %v643_v40 = vpop.f32.mrb[22].mxu1 }
 0x1fa   : > { %v1341_v10 = vpop.eup %1340  ;;  %v682_v44 = vsub.f32 0.0, %v1773_v9  ;;  %v1777_v12 = vadd.f32 %v1760_v45, %v643_v40  ;;  %v1159_v14 = vpop.f32.mrb[23].mxu1 }
 0x1fb   : > { %1346 = vrcp.f32 %v717_v33  ;;  %v718_v15 = vadd.f32 1.0, %v1341_v10 }
 0x1fc   : > { %v699_v16 = vmul.f32 1.442695, %v682_v44  ;;  %v683_v17 = vsub.f32 0.0, %v1777_v12 }
 0x1fd   : > { %1348 = vrcp.f32 %v718_v15 }
 0x1fe   : > { %1350 = vpow2.f32 %v699_v16  ;;  %v701_v31 = vmul.f32 1.442695, %v683_v17 }
 0x1ff   : > { %v648_v13 = vpop.f32.mrb[24].mxu1 }
 0x200   : > { %v1343_v18 = vpop.eup %1342  ;;  %1352 = vpow2.f32 %v701_v31  ;;  %v1781_v19 = vadd.f32 %v1760_v45, %v648_v13  ;;  %v1162_v20 = vpop.f32.mrb[25].mxu1 }
 0x201   : > { %v719_v22 = vadd.f32 1.0, %v1343_v18  ;;  %v651_v57 = vpop.f32.mrb[26].mxu1 }
 0x202   : > { %v1345_v53 = vpop.eup %1344  ;;  %v684_v60 = vsub.f32 0.0, %v1781_v19  ;;  %v1785_v23 = vadd.f32 %v1760_v45, %v651_v57  ;;  %v1163_v0 = vpop.f32.mrb[27].mxu1 }
 0x203   : > { %1354 = vrcp.f32 %v719_v22  ;;  %v720_v24 = vadd.f32 1.0, %v1345_v53 }
 0x204   : > { %v703_v25 = vmul.f32 1.442695, %v684_v60  ;;  %v685_v26 = vsub.f32 0.0, %v1785_v23 }
 0x205   : > { %v1347_v27 = vpop.eup %1346  ;;  %1356 = vrcp.f32 %v720_v24 }
 0x206   : > { %1358 = vpow2.f32 %v703_v25  ;;  %v705_v28 = vmul.f32 1.442695, %v685_v26  ;;  %v743_v21 = vmul.f32 %v1347_v27, %v625_v47 }
 0x207   : > { %v1349_v29 = vpop.eup %1348  ;;  %v656_v30 = vpop.f32.mrb[28].mxu1 }
 0x208   : > { %v1351_v11 = vpop.eup %1350  ;;  %v744_v32 = vmul.f32 %v1349_v29, %v628_v51  ;;  %1360 = vpow2.f32 %v705_v28  ;;  %v1789_v34 = vadd.f32 %v1760_v45, %v656_v30  ;;  %v1166_v35 = vpop.f32.mrb[29].mxu1 }
 0x209   : > { %v721_v36 = vadd.f32 1.0, %v1351_v11  ;;  %v659_v38 = vpop.f32.mrb[30].mxu1 }
 0x20a   : > { %v1353_v39 = vpop.eup %1352  ;;  %v756_v41 = vpack.c.bf16 %v744_v32, %v743_v21  ;;  %v686_v42 = vsub.f32 0.0, %v1789_v34  ;;  %v1793_v43 = vadd.f32 %v1760_v45, %v659_v38  ;;  %v1167_v46 = vpop.f32.mrb[31].mxu1 }
 0x20b   : > { %1362 = vrcp.f32 %v721_v36  ;;  %v722_v48 = vadd.f32 1.0, %v1353_v39 }
 0x20c   : > { %v707_v49 = vmul.f32 1.442695, %v686_v42  ;;  %v687_v47 = vsub.f32 0.0, %v1793_v43  ;;  %1193 = vmatmul.mubr.bf16.vlgmr.msra.gmra.mrb[16].mxu0 %v756_v41 }
 0x20d   : > { %v1355_v50 = vpop.eup %1354  ;;  %1364 = vrcp.f32 %v722_v48  ;;  %1196 = vmatprep.mubr.msk.bf16.mxu0 %vm1481_vm0, %v1480_v1  ;;  %v1826_v48 = vld [vmem:[%s1917_s6] ss:$0 sm:$0xff] }
 0x20e   : > { %1366 = vpow2.f32 %v707_v49  ;;  %v709_v51 = vmul.f32 1.442695, %v687_v47  ;;  %v745_v56 = vmul.f32 %v1355_v50, %v1765_v59 }
 0x20f   : > { %v1357_v52 = vpop.eup %1356  ;;  %v664_v54 = vpop.f32.mrb[32].mxu1 }
 0x210   : > { %v1359_v55 = vpop.eup %1358  ;;  %v746_v58 = vmul.f32 %v1357_v52, %v1769_v2  ;;  %1368 = vpow2.f32 %v709_v51  ;;  %v1801_v61 = vadd.f32 %v1760_v45, %v664_v54  ;;  %v1170_v62 = vpop.f32.mrb[33].mxu1 }
 0x211   : > { %v723_v63 = vadd.f32 1.0, %v1359_v55  ;;  %v667_v3 = vpop.f32.mrb[34].mxu1 }
 0x212   : > { %v1361_v4 = vpop.eup %1360  ;;  %v688_v5 = vsub.f32 0.0, %v1801_v61  ;;  %v668_v6 = vadd.f32 %v1760_v45, %v667_v3  ;;  %v1171_v7 = vpop.f32.mrb[35].mxu1  ;;  %v757_v8 = vpack.c.bf16 %v746_v58, %v745_v56 }
 0x213   : > { %1370 = vrcp.f32 %v723_v63  ;;  %v724_v37 = vadd.f32 1.0, %v1361_v4 }
 0x214   : > { %v711_v33 = vmul.f32 1.442695, %v688_v5  ;;  %v689_v59 = vsub.f32 0.0, %v668_v6  ;;  %1197 = vmatmul.mubr.bf16.gmra.mrb[20].mxu0 %v757_v8 }
 0x215   : > { %v1363_v2 = vpop.eup %1362  ;;  %1372 = vrcp.f32 %v724_v37  ;;  %1200 = vmatprep.mubr.msk.bf16.mxu0 %vm1481_vm0, %v1480_v1 }
 0x216   : > { %1374 = vpow2.f32 %v711_v33  ;;  %v713_v40 = vmul.f32 1.442695, %v689_v59  ;;  %v747_v15 = vmul.f32 %v1363_v2, %v1773_v9 }
 0x217   : > { %v1365_v10 = vpop.eup %1364  ;;  %v672_v44 = vpop.f32.mrb[36].mxu1 }
 0x218   : > { %v1367_v14 = vpop.eup %1366  ;;  %v748_v16 = vmul.f32 %v1365_v10, %v1777_v12  ;;  %1376 = vpow2.f32 %v713_v40  ;;  %v673_v17 = vadd.f32 %v1760_v45, %v672_v44  ;;  %v1174_v31 = vpop.f32.mrb[37].mxu1 }
 0x219   : > { %v725_v13 = vadd.f32 1.0, %v1367_v14  ;;  %v675_v18 = vpop.f32.mrb[38].mxu1 }
 0x21a   : > { %v1369_v20 = vpop.eup %1368  ;;  %v690_v22 = vsub.f32 0.0, %v673_v17  ;;  %v1175_v57 = vpop.f32.mrb[39].mxu1  ;;  %v758_v53 = vpack.c.bf16 %v748_v16, %v747_v15 }
 0x21b   : > { %1378 = vrcp.f32 %v725_v13  ;;  %v726_v60 = vadd.f32 1.0, %v1369_v20 }
 0x21c   : > { %v715_v0 = vmul.f32 1.442695, %v690_v22  ;;  %1201 = vmatmul.mubr.bf16.gmra.mrb[24].mxu0 %v758_v53 }
 0x21d   : > { %v1371_v24 = vpop.eup %1370  ;;  %1380 = vrcp.f32 %v726_v60  ;;  %1204 = vmatprep.mubr.msk.bf16.mxu0 %vm1481_vm0, %v1480_v1 }
 0x21e   : > { %1382 = vpow2.f32 %v715_v0  ;;  %v749_v45 = vmul.f32 %v1371_v24, %v1781_v19 }
 0x21f   : > { %v1373_v9 = vpop.eup %1372 }
 0x220   : > { %v1375_v12 = vpop.eup %1374  ;;  %v750_v25 = vmul.f32 %v1373_v9, %v1785_v23 }
 0x221   : > { %v727_v26 = vadd.f32 1.0, %v1375_v12 }
 0x222   : > { %v1377_v27 = vpop.eup %1376  ;;  %v759_v28 = vpack.c.bf16 %v750_v25, %v749_v45 }
 0x223   : > { %1384 = vrcp.f32 %v727_v26  ;;  %v728_v29 = vadd.f32 1.0, %v1377_v27 }
 0x224   : > { %1205 = vmatmul.mubr.bf16.gmra.mrb[28].mxu0 %v759_v28 }
 0x225   : > { %v1379_v30 = vpop.eup %1378  ;;  %1386 = vrcp.f32 %v728_v29  ;;  %1208 = vmatprep.mubr.msk.bf16.mxu0 %vm1481_vm0, %v1480_v1 }
 0x226   : > { %v751_v32 = vmul.f32 %v1379_v30, %v1789_v34 }
 0x227   : > { %v1381_v11 = vpop.eup %1380 }
 0x228   : > { %v1383_v21 = vpop.eup %1382  ;;  %v752_v35 = vmul.f32 %v1381_v11, %v1793_v43 }
 0x229   : > { %v729_v19 = vadd.f32 1.0, %v1383_v21 }
 0x22a   : > { %v760_v36 = vpack.c.bf16 %v752_v35, %v751_v32 }
 0x22b   : > { %1388 = vrcp.f32 %v729_v19 }
 0x22c   : > { %1209 = vmatmul.mubr.bf16.gmra.mrb[32].mxu0 %v760_v36 }
 0x22d   : > { %v1385_v23 = vpop.eup %1384  ;;  %1212 = vmatprep.mubr.msk.bf16.mxu0 %vm1481_vm0, %v1480_v1 }
 0x22e   : > { %v753_v39 = vmul.f32 %v1385_v23, %v1801_v61 }
 0x22f   : > { %v1387_v38 = vpop.eup %1386 }
 0x230   : > { %v754_v41 = vmul.f32 %v1387_v38, %v668_v6 }
 0x232   : > { %v761_v42 = vpack.c.bf16 %v754_v41, %v753_v39 }
 0x234   : > { %1213 = vmatmul.mubr.bf16.gmra.mrb[36].mxu0 %v761_v42 }
 0x235   : > { %v1389_v46 = vpop.eup %1388  ;;  %1216 = vmatprep.mubr.msk.bf16.mxu0 %vm1481_vm0, %v1480_v1 }
 0x236   : > { %v755_v34 = vmul.f32 %v1389_v46, %v673_v17 }
 0x238   : > { %v762_v43 = vpack.c.bf16 %v755_v34, %v755_v34 }
 0x23c   : > { %1217 = vmatmul.mubr.bf16.gmra.mrb[40].mxu0 %v762_v43 }
 0x2df   : > { %v868_v49 = vpop.f32.mrb[16].mxu0 }
 0x2e0   : > { %v869_v47 = vadd.f32 %v1826_v48, %v868_v49  ;;  %v1194_v50 = vpop.f32.mrb[17].mxu0 }
 0x2e1   : > { %v871_v51 = vpop.f32.mrb[18].mxu0 }
 0x2e2   : > { %1390 = vtanh.f32 %v869_v47  ;;  %v872_v52 = vadd.f32 %v1826_v48, %v871_v51  ;;  %v1195_v54 = vpop.f32.mrb[19].mxu0 }
 0x2e4   : > { %1392 = vtanh.f32 %v872_v52 }
 0x2e7   : > { %v876_v1 = vpop.f32.mrb[20].mxu0 }
 0x2e8   : > { %v877_v55 = vadd.f32 %v1826_v48, %v876_v1  ;;  %v1198_v56 = vpop.f32.mrb[21].mxu0 }
 0x2e9   : > { %v879_v58 = vpop.f32.mrb[22].mxu0 }
 0x2ea   : > { %1394 = vtanh.f32 %v877_v55  ;;  %v880_v61 = vadd.f32 %v1826_v48, %v879_v58  ;;  %v1199_v62 = vpop.f32.mrb[23].mxu0 }
 0x2ec   : > { %v1391_v63 = vpop.eup %1390  ;;  %1396 = vtanh.f32 %v880_v61 }
 0x2ed   : > { %935 = vst [vmem:[%s1835_s20] sm:$0xff] %v1391_v63 }
 0x2ee   : > { %v1393_v3 = vpop.eup %1392 }
 0x2ef   : > { %936 = vst [vmem:[%s1835_s20 + $0x8] sm:$0xff] %v1393_v3  ;;  %v884_v4 = vpop.f32.mrb[24].mxu0 }
 0x2f0   : > { %v885_v5 = vadd.f32 %v1826_v48, %v884_v4  ;;  %v1202_v6 = vpop.f32.mrb[25].mxu0 }
 0x2f1   : > { %v887_v7 = vpop.f32.mrb[26].mxu0 }
 0x2f2   : > { %1398 = vtanh.f32 %v885_v5  ;;  %v888_v8 = vadd.f32 %v1826_v48, %v887_v7  ;;  %v1203_v37 = vpop.f32.mrb[27].mxu0 }
 0x2f4   : > { %v1395_v33 = vpop.eup %1394  ;;  %1400 = vtanh.f32 %v888_v8 }
 0x2f5   : > { %937 = vst [vmem:[%s1835_s20 + $0x10] sm:$0xff] %v1395_v33 }
 0x2f6   : > { %v1397_v59 = vpop.eup %1396 }
 0x2f7   : > { %938 = vst [vmem:[%s1835_s20 + $0x18] sm:$0xff] %v1397_v59  ;;  %v892_v2 = vpop.f32.mrb[28].mxu0 }
 0x2f8   : > { %v893_v40 = vadd.f32 %v1826_v48, %v892_v2  ;;  %v1206_v10 = vpop.f32.mrb[29].mxu0 }
 0x2f9   : > { %v895_v44 = vpop.f32.mrb[30].mxu0 }
 0x2fa   : > { %1402 = vtanh.f32 %v893_v40  ;;  %v896_v14 = vadd.f32 %v1826_v48, %v895_v44  ;;  %v1207_v15 = vpop.f32.mrb[31].mxu0 }
 0x2fc   : > { %v1399_v16 = vpop.eup %1398  ;;  %1404 = vtanh.f32 %v896_v14 }
 0x2fd   : > { %939 = vst [vmem:[%s1835_s20 + $0x20] sm:$0xff] %v1399_v16 }
 0x2fe   : > { %v1401_v17 = vpop.eup %1400 }
 0x2ff   : > { %940 = vst [vmem:[%s1835_s20 + $0x28] sm:$0xff] %v1401_v17  ;;  %v900_v31 = vpop.f32.mrb[32].mxu0 }
 0x300   : > { %v901_v13 = vadd.f32 %v1826_v48, %v900_v31  ;;  %v1210_v18 = vpop.f32.mrb[33].mxu0 }
 0x301   : > { %v903_v20 = vpop.f32.mrb[34].mxu0 }
 0x302   : > { %1406 = vtanh.f32 %v901_v13  ;;  %v904_v22 = vadd.f32 %v1826_v48, %v903_v20  ;;  %v1211_v57 = vpop.f32.mrb[35].mxu0 }
 0x304   : > { %v1403_v53 = vpop.eup %1402  ;;  %1408 = vtanh.f32 %v904_v22 }
 0x305   : > { %941 = vst [vmem:[%s1835_s20 + $0x30] sm:$0xff] %v1403_v53 }
 0x306   : > { %v1405_v60 = vpop.eup %1404 }
 0x307   : > { %942 = vst [vmem:[%s1835_s20 + $0x38] sm:$0xff] %v1405_v60  ;;  %v908_v0 = vpop.f32.mrb[36].mxu0 }
 0x308   : > { %v909_v24 = vadd.f32 %v1826_v48, %v908_v0  ;;  %v1214_v9 = vpop.f32.mrb[37].mxu0 }
 0x309   : > { %v911_v12 = vpop.f32.mrb[38].mxu0 }
 0x30a   : > { %1410 = vtanh.f32 %v909_v24  ;;  %v912_v45 = vadd.f32 %v1826_v48, %v911_v12  ;;  %v1215_v25 = vpop.f32.mrb[39].mxu0 }
 0x30c   : > { %v1407_v26 = vpop.eup %1406  ;;  %1412 = vtanh.f32 %v912_v45 }
 0x30d   : > { %943 = vst [vmem:[%s1835_s20 + $0x40] sm:$0xff] %v1407_v26 }
 0x30e   : > { %v1409_v27 = vpop.eup %1408 }
 0x30f   : > { %944 = vst [vmem:[%s1835_s20 + $0x48] sm:$0xff] %v1409_v27  ;;  %v916_v28 = vpop.f32.mrb[40].mxu0 }
 0x310   : > { %v917_v29 = vadd.f32 %v1826_v48, %v916_v28  ;;  %v1218_v30 = vpop.f32.mrb[41].mxu0 }
 0x311   : > { %v919_v11 = vpop.f32.mrb[42].mxu0 }
 0x312   : > { %1414 = vtanh.f32 %v917_v29  ;;  %v1219_v21 = vpop.f32.mrb[43].mxu0 }
 0x314   : > { %v1411_v32 = vpop.eup %1410 }
 0x315   : > { %945 = vst [vmem:[%s1835_s20 + $0x50] sm:$0xff] %v1411_v32 }
 0x316   : > { %v1413_v35 = vpop.eup %1412 }
 0x317   : > { %946 = vst [vmem:[%s1835_s20 + $0x58] sm:$0xff] %v1413_v35 }
 0x31c   : > { %v1415_v19 = vpop.eup %1414 }
 0x31d   : > { %947 = vst [vmem:[%s1835_s20 + $0x60] sm:$0xff] %v1415_v19 }
 0x31e   : > { %1429 = shalt.err (!%p1426_p3)
}
 0x31f   : > { %s1430_s16 = scalar_lea.hbm %s1863_s8, 1664  ;;  %s1434_s19 = scalar_lea.hbm %s1918_s7, 3328 }
 0x320   : > { %p1431_p4 = scmp.ne.s32.totalorder %s1863_s8, %s1430_s16  ;;  %p1435_p9 = scmp.lt.u32.totalorder %s1863_s8, %s1918_s7 }
 0x321   : > { %p1436_p10 = scmp.lt.u32.totalorder %s1434_s19, %s1430_s16  ;;  %p1438_p12 = scmp.lt.u32.totalorder %s1430_s16, %s1863_s8 }
 0x322   : > { %p1432_p7 = pnand %p1431_p4, %p1563_p5 }
 0x323   : > { %p1437_p11 = por %p1436_p10, %p1435_p9 }
 0x324   : > { %p1433_p8 = pneg %p1432_p7 }
 0x325   : > { %p1439_p13 = por %p1438_p12, %p1437_p11 }
 0x327   : > { %p1440_p0 = pnand %p1439_p13, %p1433_p8 }
 0x329   : > { %1443 = shalt.err (!%p1440_p0)
}
 0x32a   : > { %s1483_s23 = smov 128   ;;  %s1484_s29 = smov 8  }
 0x32b   : > { %1225 = dma.vmem_to_hbm [thread:$0]  (%p1563_p5), %s1865_s22, 1664, %s1863_s8, %s1870_s9, %s1483_s23, %s1483_s23, %s1484_s29  }
 0x32c PF: > { %p1231_p1 = scmp.ge.s32.totalorder %s1478_s27, 2  ;;  %s977_s13 = sand.u32 1, %s1466_s24  }
 0x32d   : > { %s978_s28 = scalar_lea.sflag [#allocation3], %s977_s13 }
 0x32e   : > { %p1228_p2 = pnand %p1231_p1, %p1567_p6 }
 0x330   : > { %1461 = dma.done.wait (!%p1228_p2), %s978_s28, 1664  }
 0x331   : > { %1463 = vsyncadd (!%p1228_p2), %s978_s28, 4294965632  ;;  %p17_p3 = scmp.ge.s32.totalorder %s1550_s30, 4   ;;  %s1921_s24 = smov %s1470_s25 }
 0x332   : > { %s1922_s25 = smov %s1474_s26  ;;  %s1923_s26 = smov %s1561_s10 }
 0x333   : > { %s1924_s27 = smov %s1550_s30  ;;  %19 = sbr.rel (!%p17_p3) target bundleno = 3 (0x3), region = 83 }
 0x33a   :  { %983 = vsyncpa [#allocation3], 1 }
 0x33b   :  { %985 = vsyncpa [#allocation3 + $0x1], 1 }

// kernel: tpu_custom_call.1
= control target key start
LH: loop header
LB: loop body
LE: loop exit
PB: predicated region body
PF: predicated region fallthrough
CT: control target
= control target key end

     0   :  { %12 = vsyncpa [#allocation3], 0  ;;  %s1911_s0 = inlined_call_operand.vmem [shape: f32[208,32], index: 0, kind: input, shape index: {}]   ;;  %s1912_s1 = inlined_call_operand.vmem [shape: bf16[32,128], index: 1, kind: input, shape index: {}]   ;;  %s1913_s2 = inlined_call_operand.vmem [shape: f32[1,128], index: 2, kind: input, shape index: {}]   ;;  %s1914_s3 = inlined_call_operand.vmem [shape: bf16[128,128], index: 3, kind: input, shape index: {}]   ;;  %s1915_s4 = inlined_call_operand.vmem [shape: f32[1,128], index: 4, kind: input, shape index: {}]   ;;  %s1916_s5 = inlined_call_operand.vmem [shape: bf16[128,128], index: 5, kind: input, shape index: {}]   ;;  %s1917_s6 = inlined_call_operand.vmem [shape: f32[1,128], index: 6, kind: input, shape index: {}]   ;;  %s1918_s7 = inlined_call_operand.hbm [shape: f32[208,128], index: 7, kind: output, shape index: {}]  }
   0x1   :  { %14 = vsyncpa [#allocation3 + $0x1], 0  ;;  %s1525_s24 = smov 0   ;;  %s1527_s25 = smov 0  }
   0x2   :  { %s1529_s26 = smov 0   ;;  %s1531_s27 = smov 0  }
   0x3 LB: > { %s1546_s28 = sadd.s32 4294967295, %s1478_s27   ;;  %s1024_s29 = sadd.s32 4294967294, %s1478_s27   ;;  %s1478_s27 = sphi %s1531_s27, %s1924_s27   ;;  %s1474_s26 = sphi %s1529_s26, %s1923_s26   ;;  %s1470_s25 = sphi %s1527_s25, %s1922_s25   ;;  %s1466_s24 = sphi %s1525_s24, %s1921_s24  }
   0x4   : > { %s1550_s30 = sadd.s32 1, %s1478_s27   ;;  %s179_s8 = sadd.s32 1, %s1474_s26 }
   0x5   : > { %s176_s9 = ssub.s32 %s1478_s27, %s1550_s30  ;;  %p189_p0 = scmp.ne.s32.totalorder %s1474_s26, %s1470_s25 }
   0x6   : > { %p177_p1 = scmp.eq.s32.totalorder %s176_s9, 0  ;;  %p190_p2 = scmp.eq.s32.totalorder %s1546_s28, 1 }
   0x7   : > { %p195_p3 = scmp.ne.s32.totalorder %s1470_s25, %s1466_s24  ;;  %p196_p4 = scmp.eq.s32.totalorder %s1024_s29, 1 }
   0x8   : > { %s1561_s10 = scalar_select %p177_p1, %s1474_s26, %s179_s8  }
   0x9   : > { %p1563_p5 = por %p190_p2, %p189_p0  ;;  %p1567_p6 = por %p196_p4, %p195_p3 }
   0xa   : > { %p1027_p7 = scmp.ge.s32.totalorder %s1478_s27, 1  ;;  %p241_p8 = scmp.lt.s32.totalorder %s1478_s27, 3 }
   0xc   : > { %p242_p9 = pnand %p1027_p7, %p241_p8 }
   0xd   : > { %v1268_v0 = vld [vmem:[%s1912_s1] sm:$0xff] (!%p242_p9)   ;;  %v1480_v1 = vmov (!%p242_p9), 0.0   ;;  %v1269_v2 = vld [vmem:[%s1912_s1 + $0x8] sm:$0xff] (!%p242_p9)   ;;  %s273_s17 = smul.u32 (!%p242_p9), 13, %s1546_s28  ;;  %vm1481_vm0 = vmmov (!%p242_p9), 0   ;;  %vm324_vm1 = vcmask (!%p242_p9), 261120  }
   0xe   : > { %245 = sbr.rel (%p242_p9) target bundleno = 812 (0x32c), region = 48  ;;  %1100 = vmatprep.subr.bf16.mxu0 (!%p242_p9), %v1480_v1  ;;  %1220 = vmatprep.subr.bf16.mxu1 (!%p242_p9), %v1480_v1  ;;  %v1270_v23 = vld [vmem:[%s1914_s3] sm:$0xff] (!%p242_p9)   ;;  %v1271_v24 = vld [vmem:[%s1914_s3 + $0x8] sm:$0xff] (!%p242_p9)   ;;  %v1272_v25 = vld [vmem:[%s1914_s3 + $0x10] sm:$0xff] (!%p242_p9)  }
   0xf   : > { %1101 = vmatpush3.bf16.msra.mxu0 (!%p242_p9), %v1268_v0  ;;  %1222 = vmatpush3.bf16.msra.mxu1 (!%p242_p9), %v1268_v0  ;;  %p274_p10 = scmp.lt.s32.totalorder (!%p242_p9), %s273_s17, 25  ;;  %v1273_v26 = vld [vmem:[%s1914_s3 + $0x18] sm:$0xff] (!%p242_p9)   ;;  %v1274_v27 = vld [vmem:[%s1914_s3 + $0x20] sm:$0xff] (!%p242_p9)   ;;  %v1275_v28 = vld [vmem:[%s1914_s3 + $0x28] sm:$0xff] (!%p242_p9)  }
  0x10   : > { %1102 = vmatprep.subr.bf16.mxu0 (!%p242_p9), %v1480_v1  ;;  %1221 = vmatprep.subr.bf16.mxu1 (!%p242_p9), %v1480_v1  ;;  %v1276_v29 = vld [vmem:[%s1914_s3 + $0x30] sm:$0xff] (!%p242_p9)   ;;  %v1277_v30 = vld [vmem:[%s1914_s3 + $0x38] sm:$0xff] (!%p242_p9)   ;;  %v1648_v31 = vld [vmem:[%s1913_s2] ss:$0 sm:$0xff] (!%p242_p9) }
  0x11   : > { %1104 = vmatprep.mubr.msk.bf16.mxu0 (!%p242_p9), %vm1481_vm0, %v1480_v1  ;;  %1120 = vmatprep.mubr.msk.bf16.mxu1 (!%p242_p9), %vm1481_vm0, %v1480_v1 }
  0x13   : > { %1103 = vmatpush3.bf16.msra.mxu0 (!%p242_p9), %v1269_v2  ;;  %1223 = vmatpush3.bf16.msra.mxu1 (!%p242_p9), %v1269_v2 }
  0x14   : > { %1132 = vmatprep.subr.bf16.mxu1 (!%p242_p9), %v1480_v1  ;;  %1176 = vmatprep.subr.bf16.mxu0 (!%p242_p9), %v1480_v1 }
  0x15   : > { %s1926_s17 = smov (!%p274_p10, %s273_s17), 25 }
  0x16   : > { %s1028_s18 = sshll.u32 %s1926_s17, 3 }
  0x17   : > { %s277_s21 = scalar_lea.vmem %s1911_s0, %s1028_s18  ;;  %s270_s18 = sand.u32 1, %s1470_s25  }
  0x18   : > { %v281_v3 = vld [vmem:[%s277_s21] sm:$0xff]  ;;  %v282_v4 = vld [vmem:[%s277_s21 + $0x8] sm:$0xff]  ;;  %v283_v9 = vld [vmem:[%s277_s21 + $0x10] sm:$0xff]  ;;  %s1224_s19 = smul.u32 104, %s270_s18  ;;  %s1870_s9 = scalar_lea.sflag [#allocation3], %s270_s18 }
  0x19   : > { %v289_v5 = vld [vmem:[%s277_s21 + $0x40] sm:$0xff]  ;;  %v294_v6 = vpack.c.bf16 %v282_v4, %v281_v3  ;;  %v290_v7 = vld [vmem:[%s277_s21 + $0x48] sm:$0xff]  ;;  %v284_v10 = vld [vmem:[%s277_s21 + $0x18] sm:$0xff] }
  0x1a   : > { %v298_v8 = vpack.c.bf16 %v290_v7, %v289_v5  ;;  %v291_v11 = vld [vmem:[%s277_s21 + $0x50] sm:$0xff]  ;;  %v292_v12 = vld [vmem:[%s277_s21 + $0x58] sm:$0xff]  ;;  %v295_v13 = vpack.c.bf16 %v284_v10, %v283_v9  ;;  %v285_v15 = vld [vmem:[%s277_s21 + $0x20] sm:$0xff]  ;;  %s1835_s20 = scalar_lea.vmem [#allocation2], %s1224_s19 }
  0x1b   : > { %1105 = vmatmul.mubr.msk.bf16.vlgmr.msra.gmra.mrb[0].mxu0 %vm324_vm1, %v294_v6  ;;  %v299_v14 = vpack.c.bf16 %v292_v12, %v291_v11  ;;  %v286_v16 = vld [vmem:[%s277_s21 + $0x28] sm:$0xff]  ;;  %v293_v17 = vld [vmem:[%s277_s21 + $0x60] sm:$0xff]  ;;  %v287_v20 = vld [vmem:[%s277_s21 + $0x30] sm:$0xff]  ;;  %s962_s22 = sshll.u32 %s1835_s20, 4  ;;  %s1865_s22 = int_to_ptr.vmem [resolvable:$true] %s962_s22 }
  0x1c   : > { %1121 = vmatmul.mubr.msk.bf16.vlgmr.msra.gmra.mrb[0].mxu1 %vm324_vm1, %v298_v8  ;;  %1108 = vmatprep.mubr.msk.bf16.mxu0 %vm1481_vm0, %v1480_v1  ;;  %v296_v18 = vpack.c.bf16 %v286_v16, %v285_v15  ;;  %v300_v19 = vpack.c.bf16 %v293_v17, %v293_v17  ;;  %v288_v21 = vld [vmem:[%s277_s21 + $0x38] sm:$0xff]  ;;  %s1060_s21 = smul.u32 1664, %s1546_s28  ;;  %s1416_s13 = scalar_lea.vmem %s1865_s22, 1664 }
  0x1d   : > { %1124 = vmatprep.mubr.msk.bf16.mxu1 %vm1481_vm0, %v1480_v1  ;;  %v297_v22 = vpack.c.bf16 %v288_v21, %v287_v20  ;;  %1133 = vmatpush3.bf16.msra.mxu1 %v1270_v23  ;;  %p1417_p11 = scmp.ne.s32.totalorder %s1865_s22, %s1416_s13  ;;  %s1482_s28 = smov [#allocation2]  }
  0x1e   : > { %1134 = vmatprep.subr.bf16.mxu1 %v1480_v1  ;;  %s1863_s8 = scalar_lea.hbm %s1918_s7, %s1060_s21  ;;  %s1420_s14 = sshll.u32 %s1482_s28, 4  ;;  %s1421_s14 = int_to_ptr.vmem [resolvable:$false] %s1420_s14 }
  0x1f   : > { %p1418_p12 = pnand %p1417_p11, %p1563_p5  ;;  %s1422_s15 = scalar_lea.vmem %s1421_s14, 3328 }
  0x20   : > { %p1423_p0 = scmp.lt.s32.totalorder %s1865_s22, %s1421_s14  ;;  %p1424_p1 = scmp.lt.s32.totalorder %s1422_s15, %s1416_s13 }
  0x21   : > { %1135 = vmatpush3.bf16.msra.mxu1 %v1271_v24  ;;  %p1419_p13 = pneg %p1418_p12 }
  0x22   : > { %1136 = vmatprep.subr.bf16.mxu1 %v1480_v1  ;;  %p1425_p2 = por %p1424_p1, %p1423_p0 }
  0x23   : > { %1109 = vmatmul.mubr.msk.bf16.gmra.mrb[4].mxu0 %vm324_vm1, %v295_v13 }
  0x24   : > { %1125 = vmatmul.mubr.msk.bf16.gmra.mrb[4].mxu1 %vm324_vm1, %v299_v14  ;;  %1112 = vmatprep.mubr.msk.bf16.mxu0 %vm1481_vm0, %v1480_v1  ;;  %p1426_p3 = pnand %p1425_p2, %p1419_p13 }
  0x25   : > { %1128 = vmatprep.mubr.msk.bf16.mxu1 %vm1481_vm0, %v1480_v1  ;;  %1137 = vmatpush3.bf16.msra.mxu1 %v1272_v25 }
  0x26   : > { %1138 = vmatprep.subr.bf16.mxu1 %v1480_v1 }
  0x29   : > { %1139 = vmatpush3.bf16.msra.mxu1 %v1273_v26 }
  0x2a   : > { %1140 = vmatprep.subr.bf16.mxu1 %v1480_v1 }
  0x2b   : > { %1113 = vmatmul.mubr.msk.bf16.gmra.mrb[8].mxu0 %vm324_vm1, %v296_v18 }
  0x2c   : > { %1116 = vmatprep.mubr.msk.bf16.mxu0 %vm1481_vm0, %v1480_v1  ;;  %1129 = vmatmul.mubr.msk.bf16.gmra.mrb[8].mxu1 %vm324_vm1, %v300_v19 }
  0x2d   : > { %1148 = vmatprep.mubr.msk.bf16.mxu1 %vm1481_vm0, %v1480_v1  ;;  %1141 = vmatpush3.bf16.msra.mxu1 %v1274_v27 }
  0x2e   : > { %1142 = vmatprep.subr.bf16.mxu1 %v1480_v1 }
  0x31   : > { %1143 = vmatpush3.bf16.msra.mxu1 %v1275_v28 }
  0x32   : > { %1144 = vmatprep.subr.bf16.mxu1 %v1480_v1 }
  0x33   : > { %1117 = vmatmul.mubr.msk.bf16.gmra.mrb[12].mxu0 %vm324_vm1, %v297_v22 }
  0x34   : > { %1192 = vmatprep.mubr.msk.bf16.mxu0 %vm1481_vm0, %v1480_v1 }
  0x35   : > { %1145 = vmatpush3.bf16.msra.mxu1 %v1276_v29 }
  0x36   : > { %1146 = vmatprep.subr.bf16.mxu1 %v1480_v1 }
  0x39   : > { %1147 = vmatpush3.bf16.msra.mxu1 %v1277_v30 }
  0xee   : > { %v380_v32 = vpop.f32.mrb[0].mxu0 }
  0xef   : > { %v1651_v33 = vadd.f32 %v1648_v31, %v380_v32  ;;  %v1106_v34 = vpop.f32.mrb[1].mxu0  ;;  %v412_v35 = vpop.f32.mrb[0].mxu1 }
  0xf0   : > { %v383_v36 = vpop.f32.mrb[2].mxu0  ;;  %v1654_v37 = vadd.f32 %v1648_v31, %v412_v35  ;;  %v1122_v38 = vpop.f32.mrb[1].mxu1 }
  0xf1   : > { %v434_v39 = vsub.f32 0.0, %v1651_v33  ;;  %v1658_v40 = vadd.f32 %v1648_v31, %v383_v36  ;;  %v1107_v41 = vpop.f32.mrb[3].mxu0  ;;  %v415_v42 = vpop.f32.mrb[2].mxu1 }
  0xf2   : > { %v442_v43 = vsub.f32 0.0, %v1654_v37  ;;  %v1662_v44 = vadd.f32 %v1648_v31, %v415_v42  ;;  %v1123_v45 = vpop.f32.mrb[3].mxu1 }
  0xf3   : > { %v447_v46 = vmul.f32 1.442695, %v434_v39  ;;  %v435_v47 = vsub.f32 0.0, %v1658_v40 }
  0xf4   : > { %v463_v48 = vmul.f32 1.442695, %v442_v43  ;;  %v443_v49 = vsub.f32 0.0, %v1662_v44 }
  0xf5   : > { %1286 = vpow2.f32 %v447_v46  ;;  %v449_v50 = vmul.f32 1.442695, %v435_v47 }
  0xf6   : > { %1288 = vpow2.f32 %v463_v48  ;;  %v465_v51 = vmul.f32 1.442695, %v443_v49  ;;  %v388_v52 = vpop.f32.mrb[4].mxu0 }
  0xf7   : > { %1290 = vpow2.f32 %v449_v50  ;;  %v1667_v53 = vadd.f32 %v1648_v31, %v388_v52  ;;  %v1110_v54 = vpop.f32.mrb[5].mxu0  ;;  %v420_v55 = vpop.f32.mrb[4].mxu1 }
  0xf8   : > { %1292 = vpow2.f32 %v465_v51  ;;  %v391_v56 = vpop.f32.mrb[6].mxu0  ;;  %v1670_v57 = vadd.f32 %v1648_v31, %v420_v55  ;;  %v1126_v58 = vpop.f32.mrb[5].mxu1 }
  0xf9   : > { %v436_v59 = vsub.f32 0.0, %v1667_v53  ;;  %v1674_v60 = vadd.f32 %v1648_v31, %v391_v56  ;;  %v1111_v61 = vpop.f32.mrb[7].mxu0  ;;  %v423_v62 = vpop.f32.mrb[6].mxu1 }
  0xfa   : > { %v444_v63 = vsub.f32 0.0, %v1670_v57  ;;  %v1678_v0 = vadd.f32 %v1648_v31, %v423_v62  ;;  %v1127_v2 = vpop.f32.mrb[7].mxu1 }
  0xfb   : > { %v451_v3 = vmul.f32 1.442695, %v436_v59  ;;  %v437_v4 = vsub.f32 0.0, %v1674_v60 }
  0xfc   : > { %v467_v5 = vmul.f32 1.442695, %v444_v63  ;;  %v445_v6 = vsub.f32 0.0, %v1678_v0 }
  0xfd   : > { %1294 = vpow2.f32 %v451_v3  ;;  %v453_v7 = vmul.f32 1.442695, %v437_v4 }
  0xfe   : > { %1296 = vpow2.f32 %v467_v5  ;;  %v469_v8 = vmul.f32 1.442695, %v445_v6  ;;  %v396_v9 = vpop.f32.mrb[8].mxu0 }
  0xff   : > { %v1287_v10 = vpop.eup %1286  ;;  %1298 = vpow2.f32 %v453_v7  ;;  %v1683_v11 = vadd.f32 %v1648_v31, %v396_v9  ;;  %v1114_v12 = vpop.f32.mrb[9].mxu0 }
 0x100   : > { %v1685_v13 = vpop.f32.mrb[8].mxu1  ;;  %v1289_v14 = vpop.eup %1288  ;;  %v473_v15 = vadd.f32 1.0, %v1287_v10  ;;  %1300 = vpow2.f32 %v469_v8 }
 0x101   : > { %v399_v16 = vpop.f32.mrb[10].mxu0  ;;  %v1130_v17 = vpop.f32.mrb[9].mxu1  ;;  %v481_v19 = vadd.f32 1.0, %v1289_v14  ;;  %v438_v20 = vsub.f32 0.0, %v1683_v11  ;;  %v429_v9 = vadd.f32 %v1648_v31, %v1685_v13 }
 0x102   : > { %v1291_v18 = vpop.eup %1290  ;;  %v1689_v21 = vadd.f32 %v1648_v31, %v399_v16  ;;  %v1115_v22 = vpop.f32.mrb[11].mxu0  ;;  %1302 = vrcp.f32 %v473_v15 }
 0x103   : > { %v431_v23 = vpop.f32.mrb[10].mxu1  ;;  %v1293_v24 = vpop.eup %1292  ;;  %v474_v25 = vadd.f32 1.0, %v1291_v18  ;;  %1304 = vrcp.f32 %v481_v19  ;;  %v455_v28 = vmul.f32 1.442695, %v438_v20  ;;  %v446_v15 = vsub.f32 0.0, %v429_v9 }
 0x104   : > { %v1131_v26 = vpop.f32.mrb[11].mxu1  ;;  %v482_v27 = vadd.f32 1.0, %v1293_v24  ;;  %v439_v29 = vsub.f32 0.0, %v1689_v21 }
 0x105   : > { %1306 = vrcp.f32 %v474_v25  ;;  %v471_v22 = vmul.f32 1.442695, %v446_v15 }
 0x106   : > { %1308 = vrcp.f32 %v482_v27  ;;  %v457_v30 = vmul.f32 1.442695, %v439_v29  ;;  %v404_v32 = vpop.f32.mrb[12].mxu0 }
 0x107   : > { %1310 = vpow2.f32 %v455_v28  ;;  %v1295_v34 = vpop.eup %1294  ;;  %v1693_v35 = vadd.f32 %v1648_v31, %v404_v32  ;;  %v1118_v36 = vpop.f32.mrb[13].mxu0 }
 0x108   : > { %1312 = vpow2.f32 %v457_v30  ;;  %v1297_v38 = vpop.eup %1296  ;;  %v475_v39 = vadd.f32 1.0, %v1295_v34  ;;  %v407_v41 = vpop.f32.mrb[14].mxu0  ;;  %v1278_v34 = vld [vmem:[%s1916_s5] sm:$0xff]   ;;  %v1280_v36 = vld [vmem:[%s1916_s5 + $0x10] sm:$0xff]  }
 0x109   : > { %v1299_v42 = vpop.eup %1298  ;;  %v483_v43 = vadd.f32 1.0, %v1297_v38  ;;  %v440_v45 = vsub.f32 0.0, %v1693_v35  ;;  %v1697_v46 = vadd.f32 %v1648_v31, %v407_v41  ;;  %v1119_v47 = vpop.f32.mrb[15].mxu0  ;;  %1177 = vmatpush3.bf16.msra.mxu0 %v1278_v34  ;;  %v1281_v38 = vld [vmem:[%s1916_s5 + $0x18] sm:$0xff]   ;;  %v1283_v41 = vld [vmem:[%s1916_s5 + $0x28] sm:$0xff]  }
 0x10a   : > { %v1301_v48 = vpop.eup %1300  ;;  %1314 = vrcp.f32 %v475_v39  ;;  %v476_v49 = vadd.f32 1.0, %v1299_v42  ;;  %1178 = vmatprep.subr.bf16.mxu0 %v1480_v1  ;;  %v1282_v39 = vld [vmem:[%s1916_s5 + $0x20] sm:$0xff]   ;;  %v1284_v42 = vld [vmem:[%s1916_s5 + $0x30] sm:$0xff]  }
 0x10b   : > { %1316 = vrcp.f32 %v483_v43  ;;  %v484_v50 = vadd.f32 1.0, %v1301_v48  ;;  %v459_v51 = vmul.f32 1.442695, %v440_v45  ;;  %v441_v52 = vsub.f32 0.0, %v1697_v46  ;;  %v1285_v43 = vld [vmem:[%s1916_s5 + $0x38] sm:$0xff]  }
 0x10c   : > { %v1303_v54 = vpop.eup %1302  ;;  %1318 = vrcp.f32 %v476_v49  ;;  %v1760_v45 = vld [vmem:[%s1915_s4] ss:$0 sm:$0xff] }
 0x10d   : > { %v1305_v55 = vpop.eup %1304  ;;  %1320 = vrcp.f32 %v484_v50  ;;  %v461_v56 = vmul.f32 1.442695, %v441_v52  ;;  %v499_v62 = vmul.f32 %v1303_v54, %v1651_v33 }
 0x10e   : > { %v507_v59 = vmul.f32 %v1305_v55, %v1654_v37  ;;  %1322 = vpow2.f32 %v459_v51 }
 0x10f   : > { %v1307_v58 = vpop.eup %1306  ;;  %1324 = vpow2.f32 %v461_v56 }
 0x110   : > { %v1309_v61 = vpop.eup %1308  ;;  %v500_v63 = vmul.f32 %v1307_v58, %v1658_v40 }
 0x111   : > { %v1311_v2 = vpop.eup %1310  ;;  %v508_v3 = vmul.f32 %v1309_v61, %v1662_v44 }
 0x112   : > { %v1313_v4 = vpop.eup %1312  ;;  %v512_v5 = vpack.c.bf16 %v500_v63, %v499_v62  ;;  %v477_v6 = vadd.f32 1.0, %v1311_v2 }
 0x113   : > { %v478_v7 = vadd.f32 1.0, %v1313_v4  ;;  %v516_v8 = vpack.c.bf16 %v508_v3, %v507_v59 }
 0x114   : > { %1326 = vrcp.f32 %v477_v6  ;;  %1149 = vmatmul.mubr.bf16.vlgmr.msra.gmra.mrb[12].mxu1 %v512_v5  ;;  %v1315_v37 = vpop.eup %1314 }
 0x115   : > { %1328 = vrcp.f32 %v478_v7  ;;  %1152 = vmatprep.mubr.msk.bf16.mxu1 %vm1481_vm0, %v1480_v1  ;;  %v1317_v33 = vpop.eup %1316  ;;  %v501_v12 = vmul.f32 %v1315_v37, %v1667_v53 }
 0x116   : > { %v1319_v40 = vpop.eup %1318  ;;  %v509_v10 = vmul.f32 %v1317_v33, %v1670_v57 }
 0x117   : > { %v1321_v44 = vpop.eup %1320  ;;  %v502_v14 = vmul.f32 %v1319_v40, %v1674_v60 }
 0x118   : > { %v1323_v16 = vpop.eup %1322  ;;  %v510_v17 = vmul.f32 %v1321_v44, %v1678_v0 }
 0x119   : > { %v1325_v31 = vpop.eup %1324  ;;  %v479_v13 = vadd.f32 1.0, %v1323_v16  ;;  %v513_v18 = vpack.c.bf16 %v502_v14, %v501_v12 }
 0x11a   : > { %v480_v19 = vadd.f32 1.0, %v1325_v31  ;;  %v517_v20 = vpack.c.bf16 %v510_v17, %v509_v10 }
 0x11b   : > { %1330 = vrcp.f32 %v479_v13 }
 0x11c   : > { %1153 = vmatmul.mubr.bf16.gmra.mrb[16].mxu1 %v513_v18  ;;  %1332 = vrcp.f32 %v480_v19 }
 0x11d   : > { %1156 = vmatprep.mubr.msk.bf16.mxu1 %vm1481_vm0, %v1480_v1  ;;  %1334 = vpow2.f32 %v471_v22 }
 0x11e   : > { %v1327_v57 = vpop.eup %1326 }
 0x11f   : > { %v1329_v53 = vpop.eup %1328  ;;  %v503_v60 = vmul.f32 %v1327_v57, %v1683_v11 }
 0x120   : > { %v504_v23 = vmul.f32 %v1329_v53, %v1689_v21 }
 0x122   : > { %v514_v0 = vpack.c.bf16 %v504_v23, %v503_v60 }
 0x124   : > { %1157 = vmatmul.mubr.bf16.gmra.mrb[20].mxu1 %v514_v0 }
 0x125   : > { %1160 = vmatprep.mubr.msk.bf16.mxu1 %vm1481_vm0, %v1480_v1  ;;  %v1331_v24 = vpop.eup %1330 }
 0x126   : > { %v1333_v25 = vpop.eup %1332  ;;  %v505_v26 = vmul.f32 %v1331_v24, %v1693_v35  ;;  %v1279_v35 = vld [vmem:[%s1916_s5 + $0x8] sm:$0xff]  }
 0x127   : > { %v506_v27 = vmul.f32 %v1333_v25, %v1697_v46  ;;  %v1335_v28 = vpop.eup %1334  ;;  %1179 = vmatpush3.bf16.msra.mxu0 %v1279_v35 }
 0x128   : > { %v485_v30 = vadd.f32 1.0, %v1335_v28  ;;  %1180 = vmatprep.subr.bf16.mxu0 %v1480_v1 }
 0x129   : > { %v515_v29 = vpack.c.bf16 %v506_v27, %v505_v26 }
 0x12a   : > { %1336 = vrcp.f32 %v485_v30 }
 0x12b   : > { %1181 = vmatpush3.bf16.msra.mxu0 %v1280_v36 }
 0x12c   : > { %1161 = vmatmul.mubr.bf16.gmra.mrb[24].mxu1 %v515_v29  ;;  %1182 = vmatprep.subr.bf16.mxu0 %v1480_v1 }
 0x12d   : > { %1164 = vmatprep.mubr.msk.bf16.mxu1 %vm1481_vm0, %v1480_v1 }
 0x12f   : > { %1183 = vmatpush3.bf16.msra.mxu0 %v1281_v38 }
 0x130   : > { %1184 = vmatprep.subr.bf16.mxu0 %v1480_v1 }
 0x133   : > { %1185 = vmatpush3.bf16.msra.mxu0 %v1282_v39 }
 0x134   : > { %1165 = vmatmul.mubr.bf16.gmra.mrb[28].mxu1 %v516_v8  ;;  %v1337_v11 = vpop.eup %1336  ;;  %1186 = vmatprep.subr.bf16.mxu0 %v1480_v1 }
 0x135   : > { %1168 = vmatprep.mubr.msk.bf16.mxu1 %vm1481_vm0, %v1480_v1  ;;  %v511_v21 = vmul.f32 %v1337_v11, %v429_v9 }
 0x137   : > { %v518_v32 = vpack.c.bf16 %v511_v21, %v511_v21  ;;  %1187 = vmatpush3.bf16.msra.mxu0 %v1283_v41 }
 0x138   : > { %1188 = vmatprep.subr.bf16.mxu0 %v1480_v1 }
 0x13b   : > { %1189 = vmatpush3.bf16.msra.mxu0 %v1284_v42 }
 0x13c   : > { %1169 = vmatmul.mubr.bf16.gmra.mrb[32].mxu1 %v517_v20  ;;  %1190 = vmatprep.subr.bf16.mxu0 %v1480_v1 }
 0x13d   : > { %1172 = vmatprep.mubr.msk.bf16.mxu1 %vm1481_vm0, %v1480_v1 }
 0x13f   : > { %1191 = vmatpush3.bf16.msra.mxu0 %v1285_v43 }
 0x144   : > { %1173 = vmatmul.mubr.bf16.gmra.mrb[36].mxu1 %v518_v32 }
 0x1e7   : > { %v624_v46 = vpop.f32.mrb[12].mxu1 }
 0x1e8   : > { %v625_v47 = vadd.f32 %v1760_v45, %v624_v46  ;;  %v1150_v48 = vpop.f32.mrb[13].mxu1 }
 0x1e9   : > { %v627_v49 = vpop.f32.mrb[14].mxu1 }
 0x1ea   : > { %v678_v50 = vsub.f32 0.0, %v625_v47  ;;  %v628_v51 = vadd.f32 %v1760_v45, %v627_v49  ;;  %v1151_v52 = vpop.f32.mrb[15].mxu1 }
 0x1ec   : > { %v691_v54 = vmul.f32 1.442695, %v678_v50  ;;  %v679_v55 = vsub.f32 0.0, %v628_v51 }
 0x1ee   : > { %1338 = vpow2.f32 %v691_v54  ;;  %v693_v56 = vmul.f32 1.442695, %v679_v55 }
 0x1ef   : > { %v632_v58 = vpop.f32.mrb[16].mxu1 }
 0x1f0   : > { %1340 = vpow2.f32 %v693_v56  ;;  %v1765_v59 = vadd.f32 %v1760_v45, %v632_v58  ;;  %v1154_v61 = vpop.f32.mrb[17].mxu1 }
 0x1f1   : > { %v635_v62 = vpop.f32.mrb[18].mxu1 }
 0x1f2   : > { %v680_v63 = vsub.f32 0.0, %v1765_v59  ;;  %v1769_v2 = vadd.f32 %v1760_v45, %v635_v62  ;;  %v1155_v3 = vpop.f32.mrb[19].mxu1 }
 0x1f4   : > { %v695_v4 = vmul.f32 1.442695, %v680_v63  ;;  %v681_v5 = vsub.f32 0.0, %v1769_v2 }
 0x1f6   : > { %1342 = vpow2.f32 %v695_v4  ;;  %v697_v6 = vmul.f32 1.442695, %v681_v5 }
 0x1f7   : > { %v640_v7 = vpop.f32.mrb[20].mxu1 }
 0x1f8   : > { %v1339_v8 = vpop.eup %1338  ;;  %1344 = vpow2.f32 %v697_v6  ;;  %v1773_v9 = vadd.f32 %v1760_v45, %v640_v7  ;;  %v1158_v37 = vpop.f32.mrb[21].mxu1 }
 0x1f9   : > { %v717_v33 = vadd.f32 1.0, %v1339_v8  ;;  %v643_v40 = vpop.f32.mrb[22].mxu1 }
 0x1fa   : > { %v1341_v10 = vpop.eup %1340  ;;  %v682_v44 = vsub.f32 0.0, %v1773_v9  ;;  %v1777_v12 = vadd.f32 %v1760_v45, %v643_v40  ;;  %v1159_v14 = vpop.f32.mrb[23].mxu1 }
 0x1fb   : > { %1346 = vrcp.f32 %v717_v33  ;;  %v718_v15 = vadd.f32 1.0, %v1341_v10 }
 0x1fc   : > { %v699_v16 = vmul.f32 1.442695, %v682_v44  ;;  %v683_v17 = vsub.f32 0.0, %v1777_v12 }
 0x1fd   : > { %1348 = vrcp.f32 %v718_v15 }
 0x1fe   : > { %1350 = vpow2.f32 %v699_v16  ;;  %v701_v31 = vmul.f32 1.442695, %v683_v17 }
 0x1ff   : > { %v648_v13 = vpop.f32.mrb[24].mxu1 }
 0x200   : > { %v1343_v18 = vpop.eup %1342  ;;  %1352 = vpow2.f32 %v701_v31  ;;  %v1781_v19 = vadd.f32 %v1760_v45, %v648_v13  ;;  %v1162_v20 = vpop.f32.mrb[25].mxu1 }
 0x201   : > { %v719_v22 = vadd.f32 1.0, %v1343_v18  ;;  %v651_v57 = vpop.f32.mrb[26].mxu1 }
 0x202   : > { %v1345_v53 = vpop.eup %1344  ;;  %v684_v60 = vsub.f32 0.0, %v1781_v19  ;;  %v1785_v23 = vadd.f32 %v1760_v45, %v651_v57  ;;  %v1163_v0 = vpop.f32.mrb[27].mxu1 }
 0x203   : > { %1354 = vrcp.f32 %v719_v22  ;;  %v720_v24 = vadd.f32 1.0, %v1345_v53 }
 0x204   : > { %v703_v25 = vmul.f32 1.442695, %v684_v60  ;;  %v685_v26 = vsub.f32 0.0, %v1785_v23 }
 0x205   : > { %v1347_v27 = vpop.eup %1346  ;;  %1356 = vrcp.f32 %v720_v24 }
 0x206   : > { %1358 = vpow2.f32 %v703_v25  ;;  %v705_v28 = vmul.f32 1.442695, %v685_v26  ;;  %v743_v21 = vmul.f32 %v1347_v27, %v625_v47 }
 0x207   : > { %v1349_v29 = vpop.eup %1348  ;;  %v656_v30 = vpop.f32.mrb[28].mxu1 }
 0x208   : > { %v1351_v11 = vpop.eup %1350  ;;  %v744_v32 = vmul.f32 %v1349_v29, %v628_v51  ;;  %1360 = vpow2.f32 %v705_v28  ;;  %v1789_v34 = vadd.f32 %v1760_v45, %v656_v30  ;;  %v1166_v35 = vpop.f32.mrb[29].mxu1 }
 0x209   : > { %v721_v36 = vadd.f32 1.0, %v1351_v11  ;;  %v659_v38 = vpop.f32.mrb[30].mxu1 }
 0x20a   : > { %v1353_v39 = vpop.eup %1352  ;;  %v756_v41 = vpack.c.bf16 %v744_v32, %v743_v21  ;;  %v686_v42 = vsub.f32 0.0, %v1789_v34  ;;  %v1793_v43 = vadd.f32 %v1760_v45, %v659_v38  ;;  %v1167_v46 = vpop.f32.mrb[31].mxu1 }
 0x20b   : > { %1362 = vrcp.f32 %v721_v36  ;;  %v722_v48 = vadd.f32 1.0, %v1353_v39 }
 0x20c   : > { %v707_v49 = vmul.f32 1.442695, %v686_v42  ;;  %v687_v47 = vsub.f32 0.0, %v1793_v43  ;;  %1193 = vmatmul.mubr.bf16.vlgmr.msra.gmra.mrb[16].mxu0 %v756_v41 }
 0x20d   : > { %v1355_v50 = vpop.eup %1354  ;;  %1364 = vrcp.f32 %v722_v48  ;;  %1196 = vmatprep.mubr.msk.bf16.mxu0 %vm1481_vm0, %v1480_v1  ;;  %v1826_v48 = vld [vmem:[%s1917_s6] ss:$0 sm:$0xff] }
 0x20e   : > { %1366 = vpow2.f32 %v707_v49  ;;  %v709_v51 = vmul.f32 1.442695, %v687_v47  ;;  %v745_v56 = vmul.f32 %v1355_v50, %v1765_v59 }
 0x20f   : > { %v1357_v52 = vpop.eup %1356  ;;  %v664_v54 = vpop.f32.mrb[32].mxu1 }
 0x210   : > { %v1359_v55 = vpop.eup %1358  ;;  %v746_v58 = vmul.f32 %v1357_v52, %v1769_v2  ;;  %1368 = vpow2.f32 %v709_v51  ;;  %v1801_v61 = vadd.f32 %v1760_v45, %v664_v54  ;;  %v1170_v62 = vpop.f32.mrb[33].mxu1 }
 0x211   : > { %v723_v63 = vadd.f32 1.0, %v1359_v55  ;;  %v667_v3 = vpop.f32.mrb[34].mxu1 }
 0x212   : > { %v1361_v4 = vpop.eup %1360  ;;  %v688_v5 = vsub.f32 0.0, %v1801_v61  ;;  %v668_v6 = vadd.f32 %v1760_v45, %v667_v3  ;;  %v1171_v7 = vpop.f32.mrb[35].mxu1  ;;  %v757_v8 = vpack.c.bf16 %v746_v58, %v745_v56 }
 0x213   : > { %1370 = vrcp.f32 %v723_v63  ;;  %v724_v37 = vadd.f32 1.0, %v1361_v4 }
 0x214   : > { %v711_v33 = vmul.f32 1.442695, %v688_v5  ;;  %v689_v59 = vsub.f32 0.0, %v668_v6  ;;  %1197 = vmatmul.mubr.bf16.gmra.mrb[20].mxu0 %v757_v8 }
 0x215   : > { %v1363_v2 = vpop.eup %1362  ;;  %1372 = vrcp.f32 %v724_v37  ;;  %1200 = vmatprep.mubr.msk.bf16.mxu0 %vm1481_vm0, %v1480_v1 }
 0x216   : > { %1374 = vpow2.f32 %v711_v33  ;;  %v713_v40 = vmul.f32 1.442695, %v689_v59  ;;  %v747_v15 = vmul.f32 %v1363_v2, %v1773_v9 }
 0x217   : > { %v1365_v10 = vpop.eup %1364  ;;  %v672_v44 = vpop.f32.mrb[36].mxu1 }
 0x218   : > { %v1367_v14 = vpop.eup %1366  ;;  %v748_v16 = vmul.f32 %v1365_v10, %v1777_v12  ;;  %1376 = vpow2.f32 %v713_v40  ;;  %v673_v17 = vadd.f32 %v1760_v45, %v672_v44  ;;  %v1174_v31 = vpop.f32.mrb[37].mxu1 }
 0x219   : > { %v725_v13 = vadd.f32 1.0, %v1367_v14  ;;  %v675_v18 = vpop.f32.mrb[38].mxu1 }
 0x21a   : > { %v1369_v20 = vpop.eup %1368  ;;  %v690_v22 = vsub.f32 0.0, %v673_v17  ;;  %v1175_v57 = vpop.f32.mrb[39].mxu1  ;;  %v758_v53 = vpack.c.bf16 %v748_v16, %v747_v15 }
 0x21b   : > { %1378 = vrcp.f32 %v725_v13  ;;  %v726_v60 = vadd.f32 1.0, %v1369_v20 }
 0x21c   : > { %v715_v0 = vmul.f32 1.442695, %v690_v22  ;;  %1201 = vmatmul.mubr.bf16.gmra.mrb[24].mxu0 %v758_v53 }
 0x21d   : > { %v1371_v24 = vpop.eup %1370  ;;  %1380 = vrcp.f32 %v726_v60  ;;  %1204 = vmatprep.mubr.msk.bf16.mxu0 %vm1481_vm0, %v1480_v1 }
 0x21e   : > { %1382 = vpow2.f32 %v715_v0  ;;  %v749_v45 = vmul.f32 %v1371_v24, %v1781_v19 }
 0x21f   : > { %v1373_v9 = vpop.eup %1372 }
 0x220   : > { %v1375_v12 = vpop.eup %1374  ;;  %v750_v25 = vmul.f32 %v1373_v9, %v1785_v23 }
 0x221   : > { %v727_v26 = vadd.f32 1.0, %v1375_v12 }
 0x222   : > { %v1377_v27 = vpop.eup %1376  ;;  %v759_v28 = vpack.c.bf16 %v750_v25, %v749_v45 }
 0x223   : > { %1384 = vrcp.f32 %v727_v26  ;;  %v728_v29 = vadd.f32 1.0, %v1377_v27 }
 0x224   : > { %1205 = vmatmul.mubr.bf16.gmra.mrb[28].mxu0 %v759_v28 }
 0x225   : > { %v1379_v30 = vpop.eup %1378  ;;  %1386 = vrcp.f32 %v728_v29  ;;  %1208 = vmatprep.mubr.msk.bf16.mxu0 %vm1481_vm0, %v1480_v1 }
 0x226   : > { %v751_v32 = vmul.f32 %v1379_v30, %v1789_v34 }
 0x227   : > { %v1381_v11 = vpop.eup %1380 }
 0x228   : > { %v1383_v21 = vpop.eup %1382  ;;  %v752_v35 = vmul.f32 %v1381_v11, %v1793_v43 }
 0x229   : > { %v729_v19 = vadd.f32 1.0, %v1383_v21 }
 0x22a   : > { %v760_v36 = vpack.c.bf16 %v752_v35, %v751_v32 }
 0x22b   : > { %1388 = vrcp.f32 %v729_v19 }
 0x22c   : > { %1209 = vmatmul.mubr.bf16.gmra.mrb[32].mxu0 %v760_v36 }
 0x22d   : > { %v1385_v23 = vpop.eup %1384  ;;  %1212 = vmatprep.mubr.msk.bf16.mxu0 %vm1481_vm0, %v1480_v1 }
 0x22e   : > { %v753_v39 = vmul.f32 %v1385_v23, %v1801_v61 }
 0x22f   : > { %v1387_v38 = vpop.eup %1386 }
 0x230   : > { %v754_v41 = vmul.f32 %v1387_v38, %v668_v6 }
 0x232   : > { %v761_v42 = vpack.c.bf16 %v754_v41, %v753_v39 }
 0x234   : > { %1213 = vmatmul.mubr.bf16.gmra.mrb[36].mxu0 %v761_v42 }
 0x235   : > { %v1389_v46 = vpop.eup %1388  ;;  %1216 = vmatprep.mubr.msk.bf16.mxu0 %vm1481_vm0, %v1480_v1 }
 0x236   : > { %v755_v34 = vmul.f32 %v1389_v46, %v673_v17 }
 0x238   : > { %v762_v43 = vpack.c.bf16 %v755_v34, %v755_v34 }
 0x23c   : > { %1217 = vmatmul.mubr.bf16.gmra.mrb[40].mxu0 %v762_v43 }
 0x2df   : > { %v868_v49 = vpop.f32.mrb[16].mxu0 }
 0x2e0   : > { %v869_v47 = vadd.f32 %v1826_v48, %v868_v49  ;;  %v1194_v50 = vpop.f32.mrb[17].mxu0 }
 0x2e1   : > { %v871_v51 = vpop.f32.mrb[18].mxu0 }
 0x2e2   : > { %1390 = vtanh.f32 %v869_v47  ;;  %v872_v52 = vadd.f32 %v1826_v48, %v871_v51  ;;  %v1195_v54 = vpop.f32.mrb[19].mxu0 }
 0x2e4   : > { %1392 = vtanh.f32 %v872_v52 }
 0x2e7   : > { %v876_v1 = vpop.f32.mrb[20].mxu0 }
 0x2e8   : > { %v877_v55 = vadd.f32 %v1826_v48, %v876_v1  ;;  %v1198_v56 = vpop.f32.mrb[21].mxu0 }
 0x2e9   : > { %v879_v58 = vpop.f32.mrb[22].mxu0 }
 0x2ea   : > { %1394 = vtanh.f32 %v877_v55  ;;  %v880_v61 = vadd.f32 %v1826_v48, %v879_v58  ;;  %v1199_v62 = vpop.f32.mrb[23].mxu0 }
 0x2ec   : > { %v1391_v63 = vpop.eup %1390  ;;  %1396 = vtanh.f32 %v880_v61 }
 0x2ed   : > { %935 = vst [vmem:[%s1835_s20] sm:$0xff] %v1391_v63 }
 0x2ee   : > { %v1393_v3 = vpop.eup %1392 }
 0x2ef   : > { %936 = vst [vmem:[%s1835_s20 + $0x8] sm:$0xff] %v1393_v3  ;;  %v884_v4 = vpop.f32.mrb[24].mxu0 }
 0x2f0   : > { %v885_v5 = vadd.f32 %v1826_v48, %v884_v4  ;;  %v1202_v6 = vpop.f32.mrb[25].mxu0 }
 0x2f1   : > { %v887_v7 = vpop.f32.mrb[26].mxu0 }
 0x2f2   : > { %1398 = vtanh.f32 %v885_v5  ;;  %v888_v8 = vadd.f32 %v1826_v48, %v887_v7  ;;  %v1203_v37 = vpop.f32.mrb[27].mxu0 }
 0x2f4   : > { %v1395_v33 = vpop.eup %1394  ;;  %1400 = vtanh.f32 %v888_v8 }
 0x2f5   : > { %937 = vst [vmem:[%s1835_s20 + $0x10] sm:$0xff] %v1395_v33 }
 0x2f6   : > { %v1397_v59 = vpop.eup %1396 }
 0x2f7   : > { %938 = vst [vmem:[%s1835_s20 + $0x18] sm:$0xff] %v1397_v59  ;;  %v892_v2 = vpop.f32.mrb[28].mxu0 }
 0x2f8   : > { %v893_v40 = vadd.f32 %v1826_v48, %v892_v2  ;;  %v1206_v10 = vpop.f32.mrb[29].mxu0 }
 0x2f9   : > { %v895_v44 = vpop.f32.mrb[30].mxu0 }
 0x2fa   : > { %1402 = vtanh.f32 %v893_v40  ;;  %v896_v14 = vadd.f32 %v1826_v48, %v895_v44  ;;  %v1207_v15 = vpop.f32.mrb[31].mxu0 }
 0x2fc   : > { %v1399_v16 = vpop.eup %1398  ;;  %1404 = vtanh.f32 %v896_v14 }
 0x2fd   : > { %939 = vst [vmem:[%s1835_s20 + $0x20] sm:$0xff] %v1399_v16 }
 0x2fe   : > { %v1401_v17 = vpop.eup %1400 }
 0x2ff   : > { %940 = vst [vmem:[%s1835_s20 + $0x28] sm:$0xff] %v1401_v17  ;;  %v900_v31 = vpop.f32.mrb[32].mxu0 }
 0x300   : > { %v901_v13 = vadd.f32 %v1826_v48, %v900_v31  ;;  %v1210_v18 = vpop.f32.mrb[33].mxu0 }
 0x301   : > { %v903_v20 = vpop.f32.mrb[34].mxu0 }
 0x302   : > { %1406 = vtanh.f32 %v901_v13  ;;  %v904_v22 = vadd.f32 %v1826_v48, %v903_v20  ;;  %v1211_v57 = vpop.f32.mrb[35].mxu0 }
 0x304   : > { %v1403_v53 = vpop.eup %1402  ;;  %1408 = vtanh.f32 %v904_v22 }
 0x305   : > { %941 = vst [vmem:[%s1835_s20 + $0x30] sm:$0xff] %v1403_v53 }
 0x306   : > { %v1405_v60 = vpop.eup %1404 }
 0x307   : > { %942 = vst [vmem:[%s1835_s20 + $0x38] sm:$0xff] %v1405_v60  ;;  %v908_v0 = vpop.f32.mrb[36].mxu0 }
 0x308   : > { %v909_v24 = vadd.f32 %v1826_v48, %v908_v0  ;;  %v1214_v9 = vpop.f32.mrb[37].mxu0 }
 0x309   : > { %v911_v12 = vpop.f32.mrb[38].mxu0 }
 0x30a   : > { %1410 = vtanh.f32 %v909_v24  ;;  %v912_v45 = vadd.f32 %v1826_v48, %v911_v12  ;;  %v1215_v25 = vpop.f32.mrb[39].mxu0 }
 0x30c   : > { %v1407_v26 = vpop.eup %1406  ;;  %1412 = vtanh.f32 %v912_v45 }
 0x30d   : > { %943 = vst [vmem:[%s1835_s20 + $0x40] sm:$0xff] %v1407_v26 }
 0x30e   : > { %v1409_v27 = vpop.eup %1408 }
 0x30f   : > { %944 = vst [vmem:[%s1835_s20 + $0x48] sm:$0xff] %v1409_v27  ;;  %v916_v28 = vpop.f32.mrb[40].mxu0 }
 0x310   : > { %v917_v29 = vadd.f32 %v1826_v48, %v916_v28  ;;  %v1218_v30 = vpop.f32.mrb[41].mxu0 }
 0x311   : > { %v919_v11 = vpop.f32.mrb[42].mxu0 }
 0x312   : > { %1414 = vtanh.f32 %v917_v29  ;;  %v1219_v21 = vpop.f32.mrb[43].mxu0 }
 0x314   : > { %v1411_v32 = vpop.eup %1410 }
 0x315   : > { %945 = vst [vmem:[%s1835_s20 + $0x50] sm:$0xff] %v1411_v32 }
 0x316   : > { %v1413_v35 = vpop.eup %1412 }
 0x317   : > { %946 = vst [vmem:[%s1835_s20 + $0x58] sm:$0xff] %v1413_v35 }
 0x31c   : > { %v1415_v19 = vpop.eup %1414 }
 0x31d   : > { %947 = vst [vmem:[%s1835_s20 + $0x60] sm:$0xff] %v1415_v19 }
 0x31e   : > { %1429 = shalt.err (!%p1426_p3)
}
 0x31f   : > { %s1430_s16 = scalar_lea.hbm %s1863_s8, 1664  ;;  %s1434_s19 = scalar_lea.hbm %s1918_s7, 3328 }
 0x320   : > { %p1431_p4 = scmp.ne.s32.totalorder %s1863_s8, %s1430_s16  ;;  %p1435_p9 = scmp.lt.u32.totalorder %s1863_s8, %s1918_s7 }
 0x321   : > { %p1436_p10 = scmp.lt.u32.totalorder %s1434_s19, %s1430_s16  ;;  %p1438_p12 = scmp.lt.u32.totalorder %s1430_s16, %s1863_s8 }
 0x322   : > { %p1432_p7 = pnand %p1431_p4, %p1563_p5 }
 0x323   : > { %p1437_p11 = por %p1436_p10, %p1435_p9 }
 0x324   : > { %p1433_p8 = pneg %p1432_p7 }
 0x325   : > { %p1439_p13 = por %p1438_p12, %p1437_p11 }
 0x327   : > { %p1440_p0 = pnand %p1439_p13, %p1433_p8 }
 0x329   : > { %1443 = shalt.err (!%p1440_p0)
}
 0x32a   : > { %s1483_s23 = smov 128   ;;  %s1484_s29 = smov 8  }
 0x32b   : > { %1225 = dma.vmem_to_hbm [thread:$0]  (%p1563_p5), %s1865_s22, 1664, %s1863_s8, %s1870_s9, %s1483_s23, %s1483_s23, %s1484_s29  }
 0x32c PF: > { %p1231_p1 = scmp.ge.s32.totalorder %s1478_s27, 2  ;;  %s977_s13 = sand.u32 1, %s1466_s24  }
 0x32d   : > { %s978_s28 = scalar_lea.sflag [#allocation3], %s977_s13 }
 0x32e   : > { %p1228_p2 = pnand %p1231_p1, %p1567_p6 }
 0x330   : > { %1461 = dma.done.wait (!%p1228_p2), %s978_s28, 1664  }
 0x331   : > { %1463 = vsyncadd (!%p1228_p2), %s978_s28, 4294965632  ;;  %p17_p3 = scmp.ge.s32.totalorder %s1550_s30, 4   ;;  %s1921_s24 = smov %s1470_s25 }
 0x332   : > { %s1922_s25 = smov %s1474_s26  ;;  %s1923_s26 = smov %s1561_s10 }
 0x333   : > { %s1924_s27 = smov %s1550_s30  ;;  %19 = sbr.rel (!%p17_p3) target bundleno = 3 (0x3), region = 83 }
 0x33a   :  { %983 = vsyncpa [#allocation3], 1 }
 0x33b   :  { %985 = vsyncpa [#allocation3 + $0x1], 1 }

</bundles_post_ra>
